<compile_context>
chip_gen: v7x
topology: tpu7x:2x2x1
jax: 0.10.0
libtpu: 0.0.40
codegen_flags: <defaults>
</compile_context>

<pallas_src>
import math
import functools

import jax
import jax.numpy as jnp
from jax import lax
from jax.experimental import pallas as pl
from jax.experimental.pallas import tpu as pltpu

NEG_INF = -1e30


def _refiner_kernel(
    # inputs
    gates_ref, x_ref, mrow_ref, mcol_ref,
    g1_ref, b1_ref, wqkv_ref, bqkv_ref, wproj_ref, bproj_ref,
    g2_ref, b2_ref, wfc1_ref, bfc1_ref, wfc2_ref, bfc2_ref,
    # outputs
    out_ref,
    # scratch
    x_sc, mbias_sc, attn_sc,
    *, batch: int, heads: int, eps: float = 1e-6, approx_recip: bool = True,
):
    M, H = x_sc.shape          # M = B * L
    B = batch
    L = M // B
    D = H // heads
    d = pl.program_id(0)
    n_layers = pl.num_programs(0)

    # ---- first layer: load residual slab, build the mask bias in-kernel ----
    @pl.when(d == 0)
    def _():
        x_sc[...] = x_ref[...].astype(jnp.float32)
        mrow = mrow_ref[...]            # [B, 1, L] key   (j) validity, 1.0 / 0.0
        mcol = mcol_ref[...]            # [B, L, 1] query (i) validity, 1.0 / 0.0
        allowed = mcol * mrow           # [B, L, L]  m[i] & m[j]
        col_ids = lax.broadcasted_iota(jnp.int32, (B, L, L), 2)
        allowed = jnp.where(col_ids == 0, 1.0, allowed)   # column 0 always attendable
        mbias_sc[...] = jnp.where(allowed > 0.5, 0.0, NEG_INF).astype(jnp.float32)

    x = x_sc[...]                       # [M, H] f32 residual stream

    # ---- adaLN gates (precomputed outside the kernel, already expanded per row) ----
    gates = gates_ref[0]                # [M, 2H] f32
    gate_msa = gates[:, :H]
    gate_mlp = gates[:, H:]

    # ---- norm1 (f32) + QKV projection (bf16 MXU, f32 accumulation) ----
    mu = jnp.mean(x, axis=-1, keepdims=True)
    var = jnp.mean(jnp.square(x - mu), axis=-1, keepdims=True)
    xn = (x - mu) * lax.rsqrt(var + eps) * g1_ref[0] + b1_ref[0]
    qkv = jnp.dot(xn.astype(jnp.bfloat16), wqkv_ref[0],
                  preferred_element_type=jnp.float32) + bqkv_ref[0]   # [M, 3H] f32

    # ---- multi-head self-attention, per batch element & head (static unroll) ----
    scale = 1.0 / math.sqrt(D)
    for b in range(B):
        r0 = b * L
        qkv_b = qkv[r0:r0 + L, :]             # [L, 3H]
        mbias_b = mbias_sc[b]                 # [L, L]
        for h in range(heads):
            # fold 1/sqrt(D) into q (fuses into the bf16 cast)
            qh = (qkv_b[:, h * D:(h + 1) * D] * scale).astype(jnp.bfloat16)
            kh = qkv_b[:, H + h * D:H + (h + 1) * D].astype(jnp.bfloat16)
            vh = qkv_b[:, 2 * H + h * D:2 * H + (h + 1) * D].astype(jnp.bfloat16)
            # q @ k^T without explicit transpose (contract dim 1 of both operands)
            s = lax.dot_general(qh, kh, (((1,), (1,)), ((), ())),
                                preferred_element_type=jnp.float32)   # [L, L] f32
            s = s + mbias_b
            s = s - jnp.max(s, axis=-1, keepdims=True)
            p = jnp.exp(s)                                            # f32 numerator
            denom = jnp.sum(p, axis=-1, keepdims=True)                # [L, 1]
            o = lax.dot_general(p.astype(jnp.bfloat16), vh,
                                (((1,), (0,)), ((), ())),
                                preferred_element_type=jnp.float32)   # [L, D] f32
            if approx_recip:
                o = o * pl.reciprocal(denom, approx=True)             # EUP, not VALU
            else:
                o = o / denom
            attn_sc[r0:r0 + L, h * D:(h + 1) * D] = o.astype(jnp.bfloat16)

    # ---- output projection + gated residual ----
    proj = jnp.dot(attn_sc[...], wproj_ref[0],
                   preferred_element_type=jnp.float32) + bproj_ref[0]
    x = x + proj * gate_msa

    # ---- norm2 + MLP (Linear -> SiLU -> Linear) + gated residual ----
    mu2 = jnp.mean(x, axis=-1, keepdims=True)
    var2 = jnp.mean(jnp.square(x - mu2), axis=-1, keepdims=True)
    xn2 = (x - mu2) * lax.rsqrt(var2 + eps) * g2_ref[0] + b2_ref[0]
    h1 = jnp.dot(xn2.astype(jnp.bfloat16), wfc1_ref[0],
                 preferred_element_type=jnp.float32) + bfc1_ref[0]
    h1 = h1 * jax.nn.sigmoid(h1)                                      # SiLU in f32
    h2 = jnp.dot(h1.astype(jnp.bfloat16), wfc2_ref[0],
                 preferred_element_type=jnp.float32) + bfc2_ref[0]
    x = x + h2 * gate_mlp

    # carry residual stream to the next layer (depth axis is sequential / "arbitrary")
    x_sc[...] = x

    @pl.when(d == n_layers - 1)
    def _():
        out_ref[...] = x.astype(out_ref.dtype)


def individual_token_refiner(x, c, mask, params, *, heads, approx_recip=True,
                             vmem_limit_bytes=48 * 1024 * 1024):
    """x: [B, L, H] f32, c: [B, H] f32, mask: [B, L] int/bool or None.
    params: dict of depth-stacked parameters (weights bf16, biases/LN params f32)."""
    B, L, H = x.shape
    M = B * L
    depth = params["wqkv"].shape[0]
    Hm = params["wfc1"].shape[-1]

    # ---- adaLN hoisted out of the kernel: gates[d, b] = SiLU(c_b) @ Wada_d + bada_d ----
    c_silu = c * jax.nn.sigmoid(c)                                        # [B, H] f32
    gates = jnp.einsum("bh,dhk->dbk", c_silu, params["wada"].astype(jnp.float32))
    gates = gates + params["bada"]                                        # [depth, B, 2H]
    # expand per row so the kernel needs no in-kernel batch broadcast / reshape
    gates_rows = jnp.broadcast_to(gates[:, :, None, :], (depth, B, L, 2 * H))
    gates_rows = gates_rows.reshape(depth, M, 2 * H)

    if mask is None:
        mask_f = jnp.ones((B, L), jnp.float32)
    else:
        mask_f = mask.astype(jnp.float32)
    mask_row = mask_f.reshape(B, 1, L)   # key (j) validity
    mask_col = mask_f.reshape(B, L, 1)   # query (i) validity

    x2d = x.reshape(M, H)

    def wspec(*shape):
        zeros = (0,) * len(shape)
        return pl.BlockSpec((1,) + shape, lambda d: (d,) + zeros)

    in_specs = [
        pl.BlockSpec((1, M, 2 * H), lambda d: (d, 0, 0)),   # adaLN gates (per layer)
        pl.BlockSpec((M, H), lambda d: (0, 0)),             # x (VMEM-resident over depth)
        pl.BlockSpec((B, 1, L), lambda d: (0, 0, 0)),       # mask (row / key)
        pl.BlockSpec((B, L, 1), lambda d: (0, 0, 0)),       # mask (col / query)
        wspec(1, H), wspec(1, H),                           # norm1 gamma/beta
        wspec(H, 3 * H), wspec(1, 3 * H),                   # qkv w/b
        wspec(H, H), wspec(1, H),                           # proj w/b
        wspec(1, H), wspec(1, H),                           # norm2 gamma/beta
        wspec(H, Hm), wspec(1, Hm),                         # fc1 w/b
        wspec(Hm, H), wspec(1, H),                          # fc2 w/b
    ]

    # advisory cost estimate so XLA schedules around this long-running custom call
    flops = int(depth * (2 * M * H * (3 * H + H + 2 * Hm) + 4 * B * L * L * H))
    transc = int(depth * (B * heads * L * L + M * Hm))
    bytes_w = int(depth * 2 * (3 * H * H + H * H + 2 * H * Hm))           # bf16 weights
    bytes_a = int(2 * M * H * 4 + depth * M * 2 * H * 4)
    cost = pl.CostEstimate(flops=flops, transcendentals=transc,
                           bytes_accessed=bytes_w + bytes_a)

    kernel = functools.partial(_refiner_kernel, batch=B, heads=heads,
                               approx_recip=approx_recip)
    out2d = pl.pallas_call(
        kernel,
        out_shape=jax.ShapeDtypeStruct((M, H), jnp.float32),
        grid=(depth,),
        in_specs=in_specs,
        out_specs=pl.BlockSpec((M, H), lambda d: (0, 0)),
        scratch_shapes=[
            pltpu.VMEM((M, H), jnp.float32),     # residual stream (carried over depth)
            pltpu.VMEM((B, L, L), jnp.float32),  # additive mask bias (built at d == 0)
            pltpu.VMEM((M, H), jnp.bfloat16),    # attention output slab (per-head writes)
        ],
        compiler_params=pltpu.CompilerParams(
            # depth carries the residual in VMEM -> must stay sequential.
            dimension_semantics=("arbitrary",),
            # conservative (fits v7x's 64 MiB); raise to ~96 MiB on v5e/v6e at scale.
            vmem_limit_bytes=vmem_limit_bytes,
        ),
        cost_estimate=cost,
    )(
        gates_rows, x2d, mask_row, mask_col,
        params["g1"], params["b1"], params["wqkv"], params["bqkv"],
        params["wproj"], params["bproj"], params["g2"], params["b2"],
        params["wfc1"], params["bfc1"], params["wfc2"], params["bfc2"],
    )
    return out2d.reshape(B, L, H)


def init_params(key, depth, hidden, mlp_hidden):
    ks = jax.random.split(key, 6)
    s = 0.02

    def w(k, shape):
        return (s * jax.random.normal(k, (depth,) + shape, jnp.float32)).astype(jnp.bfloat16)

    return {
        "g1": jnp.ones((depth, 1, hidden), jnp.float32),
        "b1": jnp.zeros((depth, 1, hidden), jnp.float32),
        "wqkv": w(ks[0], (hidden, 3 * hidden)),
        "bqkv": jnp.zeros((depth, 1, 3 * hidden), jnp.float32),
        "wproj": w(ks[1], (hidden, hidden)),
        "bproj": jnp.zeros((depth, 1, hidden), jnp.float32),
        "g2": jnp.ones((depth, 1, hidden), jnp.float32),
        "b2": jnp.zeros((depth, 1, hidden), jnp.float32),
        "wfc1": w(ks[2], (hidden, mlp_hidden)),
        "bfc1": jnp.zeros((depth, 1, mlp_hidden), jnp.float32),
        "wfc2": w(ks[3], (mlp_hidden, hidden)),
        "bfc2": jnp.zeros((depth, 1, hidden), jnp.float32),
        "wada": w(ks[4], (hidden, 2 * hidden)),
        "bada": 0.1 * jax.random.normal(ks[5], (depth, 1, 2 * hidden), jnp.float32),
    }


def _reference(x, c, mask, params, heads):
    """Pure-JAX f32 reference (same bf16-rounded weights) of IndividualTokenRefiner."""
    B, L, H = x.shape
    D = H // heads
    depth = params["wqkv"].shape[0]
    m = mask.astype(bool)
    allowed = m[:, :, None] & m[:, None, :]
    allowed = allowed.at[:, :, 0].set(True)
    mbias = jnp.where(allowed, 0.0, NEG_INF).astype(jnp.float32)

    def ln(v, g, b):
        mu = jnp.mean(v, -1, keepdims=True)
        var = jnp.mean((v - mu) ** 2, -1, keepdims=True)
        return (v - mu) * lax.rsqrt(var + 1e-6) * g + b

    for d in range(depth):
        f32 = lambda a: a.astype(jnp.float32)
        csilu = c * jax.nn.sigmoid(c)
        ada = csilu @ f32(params["wada"][d]) + params["bada"][d, 0]
        gate_msa, gate_mlp = ada[:, :H], ada[:, H:]
        xn = ln(x, params["g1"][d, 0], params["b1"][d, 0])
        qkv = xn @ f32(params["wqkv"][d]) + params["bqkv"][d, 0]
        q = qkv[..., :H].reshape(B, L, heads, D)
        k = qkv[..., H:2 * H].reshape(B, L, heads, D)
        v = qkv[..., 2 * H:].reshape(B, L, heads, D)
        s = jnp.einsum("bqhd,bkhd->bhqk", q, k) / math.sqrt(D) + mbias[:, None]
        p = jax.nn.softmax(s, axis=-1)
        o = jnp.einsum("bhqk,bkhd->bqhd", p, v).reshape(B, L, H)
        proj = o @ f32(params["wproj"][d]) + params["bproj"][d, 0]
        x = x + proj * gate_msa[:, None, :]
        xn2 = ln(x, params["g2"][d, 0], params["b2"][d, 0])
        h1 = xn2 @ f32(params["wfc1"][d]) + params["bfc1"][d, 0]
        h1 = h1 * jax.nn.sigmoid(h1)
        h2 = h1 @ f32(params["wfc2"][d]) + params["bfc2"][d, 0]
        x = x + h2 * gate_mlp[:, None, :]
    return x


if __name__ == "__main__":
    B, L, H = 2, 8, 32
    heads = 4
    depth = 2
    mlp_hidden = int(H * 4.0)

    key = jax.random.PRNGKey(0)
    kx, kc, kp = jax.random.split(key, 3)

    x = jax.random.normal(kx, (B, L, H), jnp.float32)
    c = jax.random.normal(kc, (B, H), jnp.float32)
    # valid-token mask: first sequence fully valid, second has last 3 tokens masked
    mask = jnp.array([[1] * L, [1] * (L - 3) + [0] * 3], dtype=jnp.int32)

    params = init_params(kp, depth, H, mlp_hidden)

    out = individual_token_refiner(x, c, mask, params, heads=heads)
    out = jax.block_until_ready(out)

    assert out.shape == (B, L, H) and bool(jnp.all(jnp.isfinite(out)))
    ref = _reference(x, c, mask, params, heads)
    assert bool(jnp.allclose(out, ref, atol=5e-2, rtol=5e-2)), "mismatch vs reference"
    print("KERNEL_OK")
</pallas_src>

<mosaic_0001>
module attributes {stable_mosaic.version = 11 : i64} {
  func.func @_refiner_kernel(%arg0: i32, %arg1: memref<1x16x64xf32, #tpu.memory_space<vmem>>, %arg2: memref<16x32xf32, #tpu.memory_space<vmem>>, %arg3: memref<2x1x8xf32, #tpu.memory_space<vmem>>, %arg4: memref<2x8x1xf32, #tpu.memory_space<vmem>>, %arg5: memref<1x1x32xf32, #tpu.memory_space<vmem>>, %arg6: memref<1x1x32xf32, #tpu.memory_space<vmem>>, %arg7: memref<1x32x96xbf16, #tpu.memory_space<vmem>>, %arg8: memref<1x1x96xf32, #tpu.memory_space<vmem>>, %arg9: memref<1x32x32xbf16, #tpu.memory_space<vmem>>, %arg10: memref<1x1x32xf32, #tpu.memory_space<vmem>>, %arg11: memref<1x1x32xf32, #tpu.memory_space<vmem>>, %arg12: memref<1x1x32xf32, #tpu.memory_space<vmem>>, %arg13: memref<1x32x128xbf16, #tpu.memory_space<vmem>>, %arg14: memref<1x1x128xf32, #tpu.memory_space<vmem>>, %arg15: memref<1x128x32xbf16, #tpu.memory_space<vmem>>, %arg16: memref<1x1x32xf32, #tpu.memory_space<vmem>>, %arg17: memref<16x32xf32, #tpu.memory_space<vmem>>, %arg18: memref<16x32xf32, #tpu.memory_space<vmem>>, %arg19: memref<2x8x8xf32, #tpu.memory_space<vmem>>, %arg20: memref<16x32xbf16, #tpu.memory_space<vmem>>) attributes {dimension_semantics = [#tpu.dimension_semantics<arbitrary>], iteration_bounds = array<i64: 2>, scalar_prefetch = 0 : i64, scratch_operands = 3 : i64, tpu.core_type = #tpu.core_type<tc>, window_params = [{transform_indices = @transform_0, window_bounds = array<i64: 1, 16, 64>}, {pipeline_mode = #tpu.pipeline_mode<synchronous>, transform_indices = @transform_1, window_bounds = array<i64: 16, 32>}, {pipeline_mode = #tpu.pipeline_mode<synchronous>, transform_indices = @transform_2, window_bounds = array<i64: 2, 1, 8>}, {pipeline_mode = #tpu.pipeline_mode<synchronous>, transform_indices = @transform_3, window_bounds = array<i64: 2, 8, 1>}, {transform_indices = @transform_4, window_bounds = array<i64: 1, 1, 32>}, {transform_indices = @transform_5, window_bounds = array<i64: 1, 1, 32>}, {transform_indices = @transform_6, window_bounds = array<i64: 1, 32, 96>}, {transform_indices = @transform_7, window_bounds = array<i64: 1, 1, 96>}, {transform_indices = @transform_8, window_bounds = array<i64: 1, 32, 32>}, {transform_indices = @transform_9, window_bounds = array<i64: 1, 1, 32>}, {transform_indices = @transform_10, window_bounds = array<i64: 1, 1, 32>}, {transform_indices = @transform_11, window_bounds = array<i64: 1, 1, 32>}, {transform_indices = @transform_12, window_bounds = array<i64: 1, 32, 128>}, {transform_indices = @transform_13, window_bounds = array<i64: 1, 1, 128>}, {transform_indices = @transform_14, window_bounds = array<i64: 1, 128, 32>}, {transform_indices = @transform_15, window_bounds = array<i64: 1, 1, 32>}, {pipeline_mode = #tpu.pipeline_mode<synchronous>, transform_indices = @transform_16, window_bounds = array<i64: 16, 32>}]} {
    %c0_i32 = arith.constant 0 : i32
    %0 = arith.cmpi eq, %arg0, %c0_i32 : i32
    %1 = arith.extui %0 : i1 to i32
    %c0_i32_0 = arith.constant 0 : i32
    %2 = arith.cmpi ne, %1, %c0_i32_0 : i32
    scf.if %2 {
      %c0_118 = arith.constant 0 : index
      %c0_119 = arith.constant 0 : index
      %304 = vector.load %arg2[%c0_118, %c0_119] : memref<16x32xf32, #tpu.memory_space<vmem>>, vector<16x32xf32>
      %c0_120 = arith.constant 0 : index
      %c0_121 = arith.constant 0 : index
      %305 = vector.load %arg18[%c0_120, %c0_121] : memref<16x32xf32, #tpu.memory_space<vmem>>, vector<16x32xf32>
      tpu.vector_store %arg18[%c0_120, %c0_121], %304 {strides = array<i32>} : memref<16x32xf32, #tpu.memory_space<vmem>>, vector<16x32xf32>,
      %c0_122 = arith.constant 0 : index
      %c0_123 = arith.constant 0 : index
      %c0_124 = arith.constant 0 : index
      %306 = vector.load %arg3[%c0_122, %c0_123, %c0_124] : memref<2x1x8xf32, #tpu.memory_space<vmem>>, vector<2x1x8xf32>
      %c0_125 = arith.constant 0 : index
      %c0_126 = arith.constant 0 : index
      %c0_127 = arith.constant 0 : index
      %307 = vector.load %arg4[%c0_125, %c0_126, %c0_127] : memref<2x8x1xf32, #tpu.memory_space<vmem>>, vector<2x8x1xf32>
      %308 = vector.broadcast %307 : vector<2x8x1xf32> to vector<2x8x8xf32>
      %309 = vector.broadcast %306 : vector<2x1x8xf32> to vector<2x8x8xf32>
      %310 = arith.mulf %308, %309 : vector<2x8x8xf32>
      %311 = tpu.iota {dimensions = array<i32: 2>} : vector<2x8x8xi32>
      %c0_i32_128 = arith.constant 0 : i32
      %312 = vector.broadcast %c0_i32_128 : i32 to vector<2x8x8xi32>
      %313 = arith.cmpi eq, %311, %312 : vector<2x8x8xi32>
      %cst_129 = arith.constant 1.000000e+00 : f32
      %314 = vector.broadcast %cst_129 : f32 to vector<2x8x8xf32>
      %315 = arith.select %313, %314, %310 : vector<2x8x8xi1>, vector<2x8x8xf32>
      %cst_130 = arith.constant 5.000000e-01 : f32
      %316 = vector.broadcast %cst_130 : f32 to vector<2x8x8xf32>
      %317 = arith.cmpf ogt, %315, %316 : vector<2x8x8xf32>
      %cst_131 = arith.constant 0.000000e+00 : f32
      %cst_132 = arith.constant -1.000000e+30 : f32
      %318 = vector.broadcast %cst_131 : f32 to vector<2x8x8xf32>
      %319 = vector.broadcast %cst_132 : f32 to vector<2x8x8xf32>
      %320 = arith.select %317, %318, %319 : vector<2x8x8xi1>, vector<2x8x8xf32>
      %c0_133 = arith.constant 0 : index
      %c0_134 = arith.constant 0 : index
      %c0_135 = arith.constant 0 : index
      %321 = vector.load %arg19[%c0_133, %c0_134, %c0_135] : memref<2x8x8xf32, #tpu.memory_space<vmem>>, vector<2x8x8xf32>
      tpu.vector_store %arg19[%c0_133, %c0_134, %c0_135], %320 {strides = array<i32>} : memref<2x8x8xf32, #tpu.memory_space<vmem>>, vector<2x8x8xf32>,
    } else {
    }
    %c0 = arith.constant 0 : index
    %c0_1 = arith.constant 0 : index
    %3 = vector.load %arg18[%c0, %c0_1] : memref<16x32xf32, #tpu.memory_space<vmem>>, vector<16x32xf32>
    %c0_2 = arith.constant 0 : index
    %c0_3 = arith.constant 0 : index
    %c0_4 = arith.constant 0 : index
    %4 = vector.load %arg1[%c0_2, %c0_3, %c0_4] : memref<1x16x64xf32, #tpu.memory_space<vmem>>, vector<1x16x64xf32>
    %5 = vector.shape_cast %4 : vector<1x16x64xf32> to vector<16x64xf32>
    %6 = vector.extract_strided_slice %5 {offsets = [0, 0], sizes = [16, 32], strides = [1, 1]} : vector<16x64xf32> to vector<16x32xf32>
    %7 = vector.extract_strided_slice %5 {offsets = [0, 32], sizes = [16, 32], strides = [1, 1]} : vector<16x64xf32> to vector<16x32xf32>
    %cst = arith.constant dense<0.000000e+00> : vector<16xf32>
    %8 = vector.multi_reduction <add>, %3, %cst [1] : vector<16x32xf32> to vector<16xf32>
    %9 = vector.shape_cast %8 : vector<16xf32> to vector<16x1xf32>
    %cst_5 = arith.constant 3.200000e+01 : f32
    %10 = vector.broadcast %cst_5 : f32 to vector<16x1xf32>
    %11 = arith.divf %9, %10 : vector<16x1xf32>
    %12 = vector.broadcast %11 : vector<16x1xf32> to vector<16x32xf32>
    %13 = arith.subf %3, %12 : vector<16x32xf32>
    %14 = arith.mulf %13, %13 : vector<16x32xf32>
    %cst_6 = arith.constant dense<0.000000e+00> : vector<16xf32>
    %15 = vector.multi_reduction <add>, %14, %cst_6 [1] : vector<16x32xf32> to vector<16xf32>
    %16 = vector.shape_cast %15 : vector<16xf32> to vector<16x1xf32>
    %cst_7 = arith.constant 3.200000e+01 : f32
    %17 = vector.broadcast %cst_7 : f32 to vector<16x1xf32>
    %18 = arith.divf %16, %17 : vector<16x1xf32>
    %19 = vector.broadcast %11 : vector<16x1xf32> to vector<16x32xf32>
    %20 = arith.subf %3, %19 : vector<16x32xf32>
    %cst_8 = arith.constant 9.99999997E-7 : f32
    %21 = vector.broadcast %cst_8 : f32 to vector<16x1xf32>
    %22 = arith.addf %18, %21 : vector<16x1xf32>
    %23 = math.rsqrt %22 : vector<16x1xf32>
    %24 = vector.broadcast %23 : vector<16x1xf32> to vector<16x32xf32>
    %25 = arith.mulf %20, %24 : vector<16x32xf32>
    %c0_9 = arith.constant 0 : index
    %c0_10 = arith.constant 0 : index
    %c0_11 = arith.constant 0 : index
    %26 = vector.load %arg5[%c0_9, %c0_10, %c0_11] : memref<1x1x32xf32, #tpu.memory_space<vmem>>, vector<1x1x32xf32>
    %27 = vector.shape_cast %26 : vector<1x1x32xf32> to vector<1x32xf32>
    %28 = vector.broadcast %27 : vector<1x32xf32> to vector<16x32xf32>
    %29 = arith.mulf %25, %28 : vector<16x32xf32>
    %c0_12 = arith.constant 0 : index
    %c0_13 = arith.constant 0 : index
    %c0_14 = arith.constant 0 : index
    %30 = vector.load %arg6[%c0_12, %c0_13, %c0_14] : memref<1x1x32xf32, #tpu.memory_space<vmem>>, vector<1x1x32xf32>
    %31 = vector.shape_cast %30 : vector<1x1x32xf32> to vector<1x32xf32>
    %32 = vector.broadcast %31 : vector<1x32xf32> to vector<16x32xf32>
    %33 = arith.addf %29, %32 : vector<16x32xf32>
    %34 = arith.truncf %33 : vector<16x32xf32> to vector<16x32xbf16>
    %c0_15 = arith.constant 0 : index
    %c0_16 = arith.constant 0 : index
    %c0_17 = arith.constant 0 : index
    %35 = vector.load %arg7[%c0_15, %c0_16, %c0_17] : memref<1x32x96xbf16, #tpu.memory_space<vmem>>, vector<1x32x96xbf16>
    %36 = vector.shape_cast %35 : vector<1x32x96xbf16> to vector<32x96xbf16>
    %cst_18 = arith.constant dense<0.000000e+00> : vector<16x96xf32>
    %37 = tpu.matmul %34, %36, %cst_18 {dimension_numbers = #tpu.dot_dimension_numbers<[1], [0], [0], [1], [0, 0, 1, 1], [], []>} : vector<16x32xbf16>, vector<32x96xbf16>, vector<16x96xf32> -> vector<16x96xf32>
    %c0_19 = arith.constant 0 : index
    %c0_20 = arith.constant 0 : index
    %c0_21 = arith.constant 0 : index
    %38 = vector.load %arg8[%c0_19, %c0_20, %c0_21] : memref<1x1x96xf32, #tpu.memory_space<vmem>>, vector<1x1x96xf32>
    %39 = vector.shape_cast %38 : vector<1x1x96xf32> to vector<1x96xf32>
    %40 = vector.broadcast %39 : vector<1x96xf32> to vector<16x96xf32>
    %41 = arith.addf %37, %40 : vector<16x96xf32>
    %42 = vector.extract_strided_slice %41 {offsets = [0, 0], sizes = [8, 96], strides = [1, 1]} : vector<16x96xf32> to vector<8x96xf32>
    %c0_22 = arith.constant 0 : index
    %c0_23 = arith.constant 0 : index
    %c0_24 = arith.constant 0 : index
    %43 = vector.load %arg19[%c0_22, %c0_23, %c0_24] : memref<2x8x8xf32, #tpu.memory_space<vmem>>, vector<1x8x8xf32>
    %44 = vector.shape_cast %43 : vector<1x8x8xf32> to vector<8x8xf32>
    %45 = vector.extract_strided_slice %42 {offsets = [0, 0], sizes = [8, 8], strides = [1, 1]} : vector<8x96xf32> to vector<8x8xf32>
    %cst_25 = arith.constant 0.353553385 : f32
    %46 = vector.broadcast %cst_25 : f32 to vector<8x8xf32>
    %47 = arith.mulf %45, %46 : vector<8x8xf32>
    %48 = arith.truncf %47 : vector<8x8xf32> to vector<8x8xbf16>
    %49 = vector.extract_strided_slice %42 {offsets = [0, 32], sizes = [8, 8], strides = [1, 1]} : vector<8x96xf32> to vector<8x8xf32>
    %50 = arith.truncf %49 : vector<8x8xf32> to vector<8x8xbf16>
    %51 = vector.extract_strided_slice %42 {offsets = [0, 64], sizes = [8, 8], strides = [1, 1]} : vector<8x96xf32> to vector<8x8xf32>
    %52 = arith.truncf %51 : vector<8x8xf32> to vector<8x8xbf16>
    %cst_26 = arith.constant dense<0.000000e+00> : vector<8x8xf32>
    %53 = tpu.matmul %48, %50, %cst_26 {dimension_numbers = #tpu.dot_dimension_numbers<[1], [1], [0], [0], [0, 0, 1, 0], [], []>} : vector<8x8xbf16>, vector<8x8xbf16>, vector<8x8xf32> -> vector<8x8xf32>
    %54 = arith.addf %53, %44 : vector<8x8xf32>
    %cst_27 = arith.constant dense<0xFF800000> : vector<8xf32>
    %55 = vector.multi_reduction <maximumf>, %54, %cst_27 [1] : vector<8x8xf32> to vector<8xf32>
    %56 = vector.shape_cast %55 : vector<8xf32> to vector<8x1xf32>
    %57 = vector.broadcast %56 : vector<8x1xf32> to vector<8x8xf32>
    %58 = arith.subf %54, %57 : vector<8x8xf32>
    %59 = math.exp %58 : vector<8x8xf32>
    %cst_28 = arith.constant dense<0.000000e+00> : vector<8xf32>
    %60 = vector.multi_reduction <add>, %59, %cst_28 [1] : vector<8x8xf32> to vector<8xf32>
    %61 = vector.shape_cast %60 : vector<8xf32> to vector<8x1xf32>
    %62 = arith.truncf %59 : vector<8x8xf32> to vector<8x8xbf16>
    %cst_29 = arith.constant dense<0.000000e+00> : vector<8x8xf32>
    %63 = tpu.matmul %62, %52, %cst_29 {dimension_numbers = #tpu.dot_dimension_numbers<[1], [0], [0], [1], [0, 0, 1, 1], [], []>} : vector<8x8xbf16>, vector<8x8xbf16>, vector<8x8xf32> -> vector<8x8xf32>
    %64 = tpu.reciprocal %61 {approx = true} : vector<8x1xf32> -> vector<8x1xf32>
    %65 = vector.broadcast %64 : vector<8x1xf32> to vector<8x8xf32>
    %66 = arith.mulf %63, %65 : vector<8x8xf32>
    %67 = arith.truncf %66 : vector<8x8xf32> to vector<8x8xbf16>
    %c0_30 = arith.constant 0 : index
    %c0_31 = arith.constant 0 : index
    %68 = vector.load %arg20[%c0_30, %c0_31] : memref<16x32xbf16, #tpu.memory_space<vmem>>, vector<8x8xbf16>
    tpu.vector_store %arg20[%c0_30, %c0_31], %67 {strides = array<i32>} : memref<16x32xbf16, #tpu.memory_space<vmem>>, vector<8x8xbf16>,
    %69 = vector.extract_strided_slice %42 {offsets = [0, 8], sizes = [8, 8], strides = [1, 1]} : vector<8x96xf32> to vector<8x8xf32>
    %cst_32 = arith.constant 0.353553385 : f32
    %70 = vector.broadcast %cst_32 : f32 to vector<8x8xf32>
    %71 = arith.mulf %69, %70 : vector<8x8xf32>
    %72 = arith.truncf %71 : vector<8x8xf32> to vector<8x8xbf16>
    %73 = vector.extract_strided_slice %42 {offsets = [0, 40], sizes = [8, 8], strides = [1, 1]} : vector<8x96xf32> to vector<8x8xf32>
    %74 = arith.truncf %73 : vector<8x8xf32> to vector<8x8xbf16>
    %75 = vector.extract_strided_slice %42 {offsets = [0, 72], sizes = [8, 8], strides = [1, 1]} : vector<8x96xf32> to vector<8x8xf32>
    %76 = arith.truncf %75 : vector<8x8xf32> to vector<8x8xbf16>
    %cst_33 = arith.constant dense<0.000000e+00> : vector<8x8xf32>
    %77 = tpu.matmul %72, %74, %cst_33 {dimension_numbers = #tpu.dot_dimension_numbers<[1], [1], [0], [0], [0, 0, 1, 0], [], []>} : vector<8x8xbf16>, vector<8x8xbf16>, vector<8x8xf32> -> vector<8x8xf32>
    %78 = arith.addf %77, %44 : vector<8x8xf32>
    %cst_34 = arith.constant dense<0xFF800000> : vector<8xf32>
    %79 = vector.multi_reduction <maximumf>, %78, %cst_34 [1] : vector<8x8xf32> to vector<8xf32>
    %80 = vector.shape_cast %79 : vector<8xf32> to vector<8x1xf32>
    %81 = vector.broadcast %80 : vector<8x1xf32> to vector<8x8xf32>
    %82 = arith.subf %78, %81 : vector<8x8xf32>
    %83 = math.exp %82 : vector<8x8xf32>
    %cst_35 = arith.constant dense<0.000000e+00> : vector<8xf32>
    %84 = vector.multi_reduction <add>, %83, %cst_35 [1] : vector<8x8xf32> to vector<8xf32>
    %85 = vector.shape_cast %84 : vector<8xf32> to vector<8x1xf32>
    %86 = arith.truncf %83 : vector<8x8xf32> to vector<8x8xbf16>
    %cst_36 = arith.constant dense<0.000000e+00> : vector<8x8xf32>
    %87 = tpu.matmul %86, %76, %cst_36 {dimension_numbers = #tpu.dot_dimension_numbers<[1], [0], [0], [1], [0, 0, 1, 1], [], []>} : vector<8x8xbf16>, vector<8x8xbf16>, vector<8x8xf32> -> vector<8x8xf32>
    %88 = tpu.reciprocal %85 {approx = true} : vector<8x1xf32> -> vector<8x1xf32>
    %89 = vector.broadcast %88 : vector<8x1xf32> to vector<8x8xf32>
    %90 = arith.mulf %87, %89 : vector<8x8xf32>
    %91 = arith.truncf %90 : vector<8x8xf32> to vector<8x8xbf16>
    %c0_37 = arith.constant 0 : index
    %c8 = arith.constant 8 : index
    %92 = vector.load %arg20[%c0_37, %c8] : memref<16x32xbf16, #tpu.memory_space<vmem>>, vector<8x8xbf16>
    tpu.vector_store %arg20[%c0_37, %c8], %91 {strides = array<i32>} : memref<16x32xbf16, #tpu.memory_space<vmem>>, vector<8x8xbf16>,
    %93 = vector.extract_strided_slice %42 {offsets = [0, 16], sizes = [8, 8], strides = [1, 1]} : vector<8x96xf32> to vector<8x8xf32>
    %cst_38 = arith.constant 0.353553385 : f32
    %94 = vector.broadcast %cst_38 : f32 to vector<8x8xf32>
    %95 = arith.mulf %93, %94 : vector<8x8xf32>
    %96 = arith.truncf %95 : vector<8x8xf32> to vector<8x8xbf16>
    %97 = vector.extract_strided_slice %42 {offsets = [0, 48], sizes = [8, 8], strides = [1, 1]} : vector<8x96xf32> to vector<8x8xf32>
    %98 = arith.truncf %97 : vector<8x8xf32> to vector<8x8xbf16>
    %99 = vector.extract_strided_slice %42 {offsets = [0, 80], sizes = [8, 8], strides = [1, 1]} : vector<8x96xf32> to vector<8x8xf32>
    %100 = arith.truncf %99 : vector<8x8xf32> to vector<8x8xbf16>
    %cst_39 = arith.constant dense<0.000000e+00> : vector<8x8xf32>
    %101 = tpu.matmul %96, %98, %cst_39 {dimension_numbers = #tpu.dot_dimension_numbers<[1], [1], [0], [0], [0, 0, 1, 0], [], []>} : vector<8x8xbf16>, vector<8x8xbf16>, vector<8x8xf32> -> vector<8x8xf32>
    %102 = arith.addf %101, %44 : vector<8x8xf32>
    %cst_40 = arith.constant dense<0xFF800000> : vector<8xf32>
    %103 = vector.multi_reduction <maximumf>, %102, %cst_40 [1] : vector<8x8xf32> to vector<8xf32>
    %104 = vector.shape_cast %103 : vector<8xf32> to vector<8x1xf32>
    %105 = vector.broadcast %104 : vector<8x1xf32> to vector<8x8xf32>
    %106 = arith.subf %102, %105 : vector<8x8xf32>
    %107 = math.exp %106 : vector<8x8xf32>
    %cst_41 = arith.constant dense<0.000000e+00> : vector<8xf32>
    %108 = vector.multi_reduction <add>, %107, %cst_41 [1] : vector<8x8xf32> to vector<8xf32>
    %109 = vector.shape_cast %108 : vector<8xf32> to vector<8x1xf32>
    %110 = arith.truncf %107 : vector<8x8xf32> to vector<8x8xbf16>
    %cst_42 = arith.constant dense<0.000000e+00> : vector<8x8xf32>
    %111 = tpu.matmul %110, %100, %cst_42 {dimension_numbers = #tpu.dot_dimension_numbers<[1], [0], [0], [1], [0, 0, 1, 1], [], []>} : vector<8x8xbf16>, vector<8x8xbf16>, vector<8x8xf32> -> vector<8x8xf32>
    %112 = tpu.reciprocal %109 {approx = true} : vector<8x1xf32> -> vector<8x1xf32>
    %113 = vector.broadcast %112 : vector<8x1xf32> to vector<8x8xf32>
    %114 = arith.mulf %111, %113 : vector<8x8xf32>
    %115 = arith.truncf %114 : vector<8x8xf32> to vector<8x8xbf16>
    %c0_43 = arith.constant 0 : index
    %c16 = arith.constant 16 : index
    %116 = vector.load %arg20[%c0_43, %c16] : memref<16x32xbf16, #tpu.memory_space<vmem>>, vector<8x8xbf16>
    tpu.vector_store %arg20[%c0_43, %c16], %115 {strides = array<i32>} : memref<16x32xbf16, #tpu.memory_space<vmem>>, vector<8x8xbf16>,
    %117 = vector.extract_strided_slice %42 {offsets = [0, 24], sizes = [8, 8], strides = [1, 1]} : vector<8x96xf32> to vector<8x8xf32>
    %cst_44 = arith.constant 0.353553385 : f32
    %118 = vector.broadcast %cst_44 : f32 to vector<8x8xf32>
    %119 = arith.mulf %117, %118 : vector<8x8xf32>
    %120 = arith.truncf %119 : vector<8x8xf32> to vector<8x8xbf16>
    %121 = vector.extract_strided_slice %42 {offsets = [0, 56], sizes = [8, 8], strides = [1, 1]} : vector<8x96xf32> to vector<8x8xf32>
    %122 = arith.truncf %121 : vector<8x8xf32> to vector<8x8xbf16>
    %123 = vector.extract_strided_slice %42 {offsets = [0, 88], sizes = [8, 8], strides = [1, 1]} : vector<8x96xf32> to vector<8x8xf32>
    %124 = arith.truncf %123 : vector<8x8xf32> to vector<8x8xbf16>
    %cst_45 = arith.constant dense<0.000000e+00> : vector<8x8xf32>
    %125 = tpu.matmul %120, %122, %cst_45 {dimension_numbers = #tpu.dot_dimension_numbers<[1], [1], [0], [0], [0, 0, 1, 0], [], []>} : vector<8x8xbf16>, vector<8x8xbf16>, vector<8x8xf32> -> vector<8x8xf32>
    %126 = arith.addf %125, %44 : vector<8x8xf32>
    %cst_46 = arith.constant dense<0xFF800000> : vector<8xf32>
    %127 = vector.multi_reduction <maximumf>, %126, %cst_46 [1] : vector<8x8xf32> to vector<8xf32>
    %128 = vector.shape_cast %127 : vector<8xf32> to vector<8x1xf32>
    %129 = vector.broadcast %128 : vector<8x1xf32> to vector<8x8xf32>
    %130 = arith.subf %126, %129 : vector<8x8xf32>
    %131 = math.exp %130 : vector<8x8xf32>
    %cst_47 = arith.constant dense<0.000000e+00> : vector<8xf32>
    %132 = vector.multi_reduction <add>, %131, %cst_47 [1] : vector<8x8xf32> to vector<8xf32>
    %133 = vector.shape_cast %132 : vector<8xf32> to vector<8x1xf32>
    %134 = arith.truncf %131 : vector<8x8xf32> to vector<8x8xbf16>
    %cst_48 = arith.constant dense<0.000000e+00> : vector<8x8xf32>
    %135 = tpu.matmul %134, %124, %cst_48 {dimension_numbers = #tpu.dot_dimension_numbers<[1], [0], [0], [1], [0, 0, 1, 1], [], []>} : vector<8x8xbf16>, vector<8x8xbf16>, vector<8x8xf32> -> vector<8x8xf32>
    %136 = tpu.reciprocal %133 {approx = true} : vector<8x1xf32> -> vector<8x1xf32>
    %137 = vector.broadcast %136 : vector<8x1xf32> to vector<8x8xf32>
    %138 = arith.mulf %135, %137 : vector<8x8xf32>
    %139 = arith.truncf %138 : vector<8x8xf32> to vector<8x8xbf16>
    %c0_49 = arith.constant 0 : index
    %c24 = arith.constant 24 : index
    %140 = vector.load %arg20[%c0_49, %c24] : memref<16x32xbf16, #tpu.memory_space<vmem>>, vector<8x8xbf16>
    tpu.vector_store %arg20[%c0_49, %c24], %139 {strides = array<i32>} : memref<16x32xbf16, #tpu.memory_space<vmem>>, vector<8x8xbf16>,
    %141 = vector.extract_strided_slice %41 {offsets = [8, 0], sizes = [8, 96], strides = [1, 1]} : vector<16x96xf32> to vector<8x96xf32>
    %c1 = arith.constant 1 : index
    %c0_50 = arith.constant 0 : index
    %c0_51 = arith.constant 0 : index
    %142 = vector.load %arg19[%c1, %c0_50, %c0_51] : memref<2x8x8xf32, #tpu.memory_space<vmem>>, vector<1x8x8xf32>
    %143 = vector.shape_cast %142 : vector<1x8x8xf32> to vector<8x8xf32>
    %144 = vector.extract_strided_slice %141 {offsets = [0, 0], sizes = [8, 8], strides = [1, 1]} : vector<8x96xf32> to vector<8x8xf32>
    %cst_52 = arith.constant 0.353553385 : f32
    %145 = vector.broadcast %cst_52 : f32 to vector<8x8xf32>
    %146 = arith.mulf %144, %145 : vector<8x8xf32>
    %147 = arith.truncf %146 : vector<8x8xf32> to vector<8x8xbf16>
    %148 = vector.extract_strided_slice %141 {offsets = [0, 32], sizes = [8, 8], strides = [1, 1]} : vector<8x96xf32> to vector<8x8xf32>
    %149 = arith.truncf %148 : vector<8x8xf32> to vector<8x8xbf16>
    %150 = vector.extract_strided_slice %141 {offsets = [0, 64], sizes = [8, 8], strides = [1, 1]} : vector<8x96xf32> to vector<8x8xf32>
    %151 = arith.truncf %150 : vector<8x8xf32> to vector<8x8xbf16>
    %cst_53 = arith.constant dense<0.000000e+00> : vector<8x8xf32>
    %152 = tpu.matmul %147, %149, %cst_53 {dimension_numbers = #tpu.dot_dimension_numbers<[1], [1], [0], [0], [0, 0, 1, 0], [], []>} : vector<8x8xbf16>, vector<8x8xbf16>, vector<8x8xf32> -> vector<8x8xf32>
    %153 = arith.addf %152, %143 : vector<8x8xf32>
    %cst_54 = arith.constant dense<0xFF800000> : vector<8xf32>
    %154 = vector.multi_reduction <maximumf>, %153, %cst_54 [1] : vector<8x8xf32> to vector<8xf32>
    %155 = vector.shape_cast %154 : vector<8xf32> to vector<8x1xf32>
    %156 = vector.broadcast %155 : vector<8x1xf32> to vector<8x8xf32>
    %157 = arith.subf %153, %156 : vector<8x8xf32>
    %158 = math.exp %157 : vector<8x8xf32>
    %cst_55 = arith.constant dense<0.000000e+00> : vector<8xf32>
    %159 = vector.multi_reduction <add>, %158, %cst_55 [1] : vector<8x8xf32> to vector<8xf32>
    %160 = vector.shape_cast %159 : vector<8xf32> to vector<8x1xf32>
    %161 = arith.truncf %158 : vector<8x8xf32> to vector<8x8xbf16>
    %cst_56 = arith.constant dense<0.000000e+00> : vector<8x8xf32>
    %162 = tpu.matmul %161, %151, %cst_56 {dimension_numbers = #tpu.dot_dimension_numbers<[1], [0], [0], [1], [0, 0, 1, 1], [], []>} : vector<8x8xbf16>, vector<8x8xbf16>, vector<8x8xf32> -> vector<8x8xf32>
    %163 = tpu.reciprocal %160 {approx = true} : vector<8x1xf32> -> vector<8x1xf32>
    %164 = vector.broadcast %163 : vector<8x1xf32> to vector<8x8xf32>
    %165 = arith.mulf %162, %164 : vector<8x8xf32>
    %166 = arith.truncf %165 : vector<8x8xf32> to vector<8x8xbf16>
    %c8_57 = arith.constant 8 : index
    %c0_58 = arith.constant 0 : index
    %167 = vector.load %arg20[%c8_57, %c0_58] : memref<16x32xbf16, #tpu.memory_space<vmem>>, vector<8x8xbf16>
    tpu.vector_store %arg20[%c8_57, %c0_58], %166 {strides = array<i32>} : memref<16x32xbf16, #tpu.memory_space<vmem>>, vector<8x8xbf16>,
    %168 = vector.extract_strided_slice %141 {offsets = [0, 8], sizes = [8, 8], strides = [1, 1]} : vector<8x96xf32> to vector<8x8xf32>
    %cst_59 = arith.constant 0.353553385 : f32
    %169 = vector.broadcast %cst_59 : f32 to vector<8x8xf32>
    %170 = arith.mulf %168, %169 : vector<8x8xf32>
    %171 = arith.truncf %170 : vector<8x8xf32> to vector<8x8xbf16>
    %172 = vector.extract_strided_slice %141 {offsets = [0, 40], sizes = [8, 8], strides = [1, 1]} : vector<8x96xf32> to vector<8x8xf32>
    %173 = arith.truncf %172 : vector<8x8xf32> to vector<8x8xbf16>
    %174 = vector.extract_strided_slice %141 {offsets = [0, 72], sizes = [8, 8], strides = [1, 1]} : vector<8x96xf32> to vector<8x8xf32>
    %175 = arith.truncf %174 : vector<8x8xf32> to vector<8x8xbf16>
    %cst_60 = arith.constant dense<0.000000e+00> : vector<8x8xf32>
    %176 = tpu.matmul %171, %173, %cst_60 {dimension_numbers = #tpu.dot_dimension_numbers<[1], [1], [0], [0], [0, 0, 1, 0], [], []>} : vector<8x8xbf16>, vector<8x8xbf16>, vector<8x8xf32> -> vector<8x8xf32>
    %177 = arith.addf %176, %143 : vector<8x8xf32>
    %cst_61 = arith.constant dense<0xFF800000> : vector<8xf32>
    %178 = vector.multi_reduction <maximumf>, %177, %cst_61 [1] : vector<8x8xf32> to vector<8xf32>
    %179 = vector.shape_cast %178 : vector<8xf32> to vector<8x1xf32>
    %180 = vector.broadcast %179 : vector<8x1xf32> to vector<8x8xf32>
    %181 = arith.subf %177, %180 : vector<8x8xf32>
    %182 = math.exp %181 : vector<8x8xf32>
    %cst_62 = arith.constant dense<0.000000e+00> : vector<8xf32>
    %183 = vector.multi_reduction <add>, %182, %cst_62 [1] : vector<8x8xf32> to vector<8xf32>
    %184 = vector.shape_cast %183 : vector<8xf32> to vector<8x1xf32>
    %185 = arith.truncf %182 : vector<8x8xf32> to vector<8x8xbf16>
    %cst_63 = arith.constant dense<0.000000e+00> : vector<8x8xf32>
    %186 = tpu.matmul %185, %175, %cst_63 {dimension_numbers = #tpu.dot_dimension_numbers<[1], [0], [0], [1], [0, 0, 1, 1], [], []>} : vector<8x8xbf16>, vector<8x8xbf16>, vector<8x8xf32> -> vector<8x8xf32>
    %187 = tpu.reciprocal %184 {approx = true} : vector<8x1xf32> -> vector<8x1xf32>
    %188 = vector.broadcast %187 : vector<8x1xf32> to vector<8x8xf32>
    %189 = arith.mulf %186, %188 : vector<8x8xf32>
    %190 = arith.truncf %189 : vector<8x8xf32> to vector<8x8xbf16>
    %c8_64 = arith.constant 8 : index
    %c8_65 = arith.constant 8 : index
    %191 = vector.load %arg20[%c8_64, %c8_65] : memref<16x32xbf16, #tpu.memory_space<vmem>>, vector<8x8xbf16>
    tpu.vector_store %arg20[%c8_64, %c8_65], %190 {strides = array<i32>} : memref<16x32xbf16, #tpu.memory_space<vmem>>, vector<8x8xbf16>,
    %192 = vector.extract_strided_slice %141 {offsets = [0, 16], sizes = [8, 8], strides = [1, 1]} : vector<8x96xf32> to vector<8x8xf32>
    %cst_66 = arith.constant 0.353553385 : f32
    %193 = vector.broadcast %cst_66 : f32 to vector<8x8xf32>
    %194 = arith.mulf %192, %193 : vector<8x8xf32>
    %195 = arith.truncf %194 : vector<8x8xf32> to vector<8x8xbf16>
    %196 = vector.extract_strided_slice %141 {offsets = [0, 48], sizes = [8, 8], strides = [1, 1]} : vector<8x96xf32> to vector<8x8xf32>
    %197 = arith.truncf %196 : vector<8x8xf32> to vector<8x8xbf16>
    %198 = vector.extract_strided_slice %141 {offsets = [0, 80], sizes = [8, 8], strides = [1, 1]} : vector<8x96xf32> to vector<8x8xf32>
    %199 = arith.truncf %198 : vector<8x8xf32> to vector<8x8xbf16>
    %cst_67 = arith.constant dense<0.000000e+00> : vector<8x8xf32>
    %200 = tpu.matmul %195, %197, %cst_67 {dimension_numbers = #tpu.dot_dimension_numbers<[1], [1], [0], [0], [0, 0, 1, 0], [], []>} : vector<8x8xbf16>, vector<8x8xbf16>, vector<8x8xf32> -> vector<8x8xf32>
    %201 = arith.addf %200, %143 : vector<8x8xf32>
    %cst_68 = arith.constant dense<0xFF800000> : vector<8xf32>
    %202 = vector.multi_reduction <maximumf>, %201, %cst_68 [1] : vector<8x8xf32> to vector<8xf32>
    %203 = vector.shape_cast %202 : vector<8xf32> to vector<8x1xf32>
    %204 = vector.broadcast %203 : vector<8x1xf32> to vector<8x8xf32>
    %205 = arith.subf %201, %204 : vector<8x8xf32>
    %206 = math.exp %205 : vector<8x8xf32>
    %cst_69 = arith.constant dense<0.000000e+00> : vector<8xf32>
    %207 = vector.multi_reduction <add>, %206, %cst_69 [1] : vector<8x8xf32> to vector<8xf32>
    %208 = vector.shape_cast %207 : vector<8xf32> to vector<8x1xf32>
    %209 = arith.truncf %206 : vector<8x8xf32> to vector<8x8xbf16>
    %cst_70 = arith.constant dense<0.000000e+00> : vector<8x8xf32>
    %210 = tpu.matmul %209, %199, %cst_70 {dimension_numbers = #tpu.dot_dimension_numbers<[1], [0], [0], [1], [0, 0, 1, 1], [], []>} : vector<8x8xbf16>, vector<8x8xbf16>, vector<8x8xf32> -> vector<8x8xf32>
    %211 = tpu.reciprocal %208 {approx = true} : vector<8x1xf32> -> vector<8x1xf32>
    %212 = vector.broadcast %211 : vector<8x1xf32> to vector<8x8xf32>
    %213 = arith.mulf %210, %212 : vector<8x8xf32>
    %214 = arith.truncf %213 : vector<8x8xf32> to vector<8x8xbf16>
    %c8_71 = arith.constant 8 : index
    %c16_72 = arith.constant 16 : index
    %215 = vector.load %arg20[%c8_71, %c16_72] : memref<16x32xbf16, #tpu.memory_space<vmem>>, vector<8x8xbf16>
    tpu.vector_store %arg20[%c8_71, %c16_72], %214 {strides = array<i32>} : memref<16x32xbf16, #tpu.memory_space<vmem>>, vector<8x8xbf16>,
    %216 = vector.extract_strided_slice %141 {offsets = [0, 24], sizes = [8, 8], strides = [1, 1]} : vector<8x96xf32> to vector<8x8xf32>
    %cst_73 = arith.constant 0.353553385 : f32
    %217 = vector.broadcast %cst_73 : f32 to vector<8x8xf32>
    %218 = arith.mulf %216, %217 : vector<8x8xf32>
    %219 = arith.truncf %218 : vector<8x8xf32> to vector<8x8xbf16>
    %220 = vector.extract_strided_slice %141 {offsets = [0, 56], sizes = [8, 8], strides = [1, 1]} : vector<8x96xf32> to vector<8x8xf32>
    %221 = arith.truncf %220 : vector<8x8xf32> to vector<8x8xbf16>
    %222 = vector.extract_strided_slice %141 {offsets = [0, 88], sizes = [8, 8], strides = [1, 1]} : vector<8x96xf32> to vector<8x8xf32>
    %223 = arith.truncf %222 : vector<8x8xf32> to vector<8x8xbf16>
    %cst_74 = arith.constant dense<0.000000e+00> : vector<8x8xf32>
    %224 = tpu.matmul %219, %221, %cst_74 {dimension_numbers = #tpu.dot_dimension_numbers<[1], [1], [0], [0], [0, 0, 1, 0], [], []>} : vector<8x8xbf16>, vector<8x8xbf16>, vector<8x8xf32> -> vector<8x8xf32>
    %225 = arith.addf %224, %143 : vector<8x8xf32>
    %cst_75 = arith.constant dense<0xFF800000> : vector<8xf32>
    %226 = vector.multi_reduction <maximumf>, %225, %cst_75 [1] : vector<8x8xf32> to vector<8xf32>
    %227 = vector.shape_cast %226 : vector<8xf32> to vector<8x1xf32>
    %228 = vector.broadcast %227 : vector<8x1xf32> to vector<8x8xf32>
    %229 = arith.subf %225, %228 : vector<8x8xf32>
    %230 = math.exp %229 : vector<8x8xf32>
    %cst_76 = arith.constant dense<0.000000e+00> : vector<8xf32>
    %231 = vector.multi_reduction <add>, %230, %cst_76 [1] : vector<8x8xf32> to vector<8xf32>
    %232 = vector.shape_cast %231 : vector<8xf32> to vector<8x1xf32>
    %233 = arith.truncf %230 : vector<8x8xf32> to vector<8x8xbf16>
    %cst_77 = arith.constant dense<0.000000e+00> : vector<8x8xf32>
    %234 = tpu.matmul %233, %223, %cst_77 {dimension_numbers = #tpu.dot_dimension_numbers<[1], [0], [0], [1], [0, 0, 1, 1], [], []>} : vector<8x8xbf16>, vector<8x8xbf16>, vector<8x8xf32> -> vector<8x8xf32>
    %235 = tpu.reciprocal %232 {approx = true} : vector<8x1xf32> -> vector<8x1xf32>
    %236 = vector.broadcast %235 : vector<8x1xf32> to vector<8x8xf32>
    %237 = arith.mulf %234, %236 : vector<8x8xf32>
    %238 = arith.truncf %237 : vector<8x8xf32> to vector<8x8xbf16>
    %c8_78 = arith.constant 8 : index
    %c24_79 = arith.constant 24 : index
    %239 = vector.load %arg20[%c8_78, %c24_79] : memref<16x32xbf16, #tpu.memory_space<vmem>>, vector<8x8xbf16>
    tpu.vector_store %arg20[%c8_78, %c24_79], %238 {strides = array<i32>} : memref<16x32xbf16, #tpu.memory_space<vmem>>, vector<8x8xbf16>,
    %c0_80 = arith.constant 0 : index
    %c0_81 = arith.constant 0 : index
    %240 = vector.load %arg20[%c0_80, %c0_81] : memref<16x32xbf16, #tpu.memory_space<vmem>>, vector<16x32xbf16>
    %c0_82 = arith.constant 0 : index
    %c0_83 = arith.constant 0 : index
    %c0_84 = arith.constant 0 : index
    %241 = vector.load %arg9[%c0_82, %c0_83, %c0_84] : memref<1x32x32xbf16, #tpu.memory_space<vmem>>, vector<1x32x32xbf16>
    %242 = vector.shape_cast %241 : vector<1x32x32xbf16> to vector<32x32xbf16>
    %cst_85 = arith.constant dense<0.000000e+00> : vector<16x32xf32>
    %243 = tpu.matmul %240, %242, %cst_85 {dimension_numbers = #tpu.dot_dimension_numbers<[1], [0], [0], [1], [0, 0, 1, 1], [], []>} : vector<16x32xbf16>, vector<32x32xbf16>, vector<16x32xf32> -> vector<16x32xf32>
    %c0_86 = arith.constant 0 : index
    %c0_87 = arith.constant 0 : index
    %c0_88 = arith.constant 0 : index
    %244 = vector.load %arg10[%c0_86, %c0_87, %c0_88] : memref<1x1x32xf32, #tpu.memory_space<vmem>>, vector<1x1x32xf32>
    %245 = vector.shape_cast %244 : vector<1x1x32xf32> to vector<1x32xf32>
    %246 = vector.broadcast %245 : vector<1x32xf32> to vector<16x32xf32>
    %247 = arith.addf %243, %246 : vector<16x32xf32>
    %248 = arith.mulf %247, %6 : vector<16x32xf32>
    %249 = arith.addf %3, %248 : vector<16x32xf32>
    %cst_89 = arith.constant dense<0.000000e+00> : vector<16xf32>
    %250 = vector.multi_reduction <add>, %249, %cst_89 [1] : vector<16x32xf32> to vector<16xf32>
    %251 = vector.shape_cast %250 : vector<16xf32> to vector<16x1xf32>
    %cst_90 = arith.constant 3.200000e+01 : f32
    %252 = vector.broadcast %cst_90 : f32 to vector<16x1xf32>
    %253 = arith.divf %251, %252 : vector<16x1xf32>
    %254 = vector.broadcast %253 : vector<16x1xf32> to vector<16x32xf32>
    %255 = arith.subf %249, %254 : vector<16x32xf32>
    %256 = arith.mulf %255, %255 : vector<16x32xf32>
    %cst_91 = arith.constant dense<0.000000e+00> : vector<16xf32>
    %257 = vector.multi_reduction <add>, %256, %cst_91 [1] : vector<16x32xf32> to vector<16xf32>
    %258 = vector.shape_cast %257 : vector<16xf32> to vector<16x1xf32>
    %cst_92 = arith.constant 3.200000e+01 : f32
    %259 = vector.broadcast %cst_92 : f32 to vector<16x1xf32>
    %260 = arith.divf %258, %259 : vector<16x1xf32>
    %261 = vector.broadcast %253 : vector<16x1xf32> to vector<16x32xf32>
    %262 = arith.subf %249, %261 : vector<16x32xf32>
    %cst_93 = arith.constant 9.99999997E-7 : f32
    %263 = vector.broadcast %cst_93 : f32 to vector<16x1xf32>
    %264 = arith.addf %260, %263 : vector<16x1xf32>
    %265 = math.rsqrt %264 : vector<16x1xf32>
    %266 = vector.broadcast %265 : vector<16x1xf32> to vector<16x32xf32>
    %267 = arith.mulf %262, %266 : vector<16x32xf32>
    %c0_94 = arith.constant 0 : index
    %c0_95 = arith.constant 0 : index
    %c0_96 = arith.constant 0 : index
    %268 = vector.load %arg11[%c0_94, %c0_95, %c0_96] : memref<1x1x32xf32, #tpu.memory_space<vmem>>, vector<1x1x32xf32>
    %269 = vector.shape_cast %268 : vector<1x1x32xf32> to vector<1x32xf32>
    %270 = vector.broadcast %269 : vector<1x32xf32> to vector<16x32xf32>
    %271 = arith.mulf %267, %270 : vector<16x32xf32>
    %c0_97 = arith.constant 0 : index
    %c0_98 = arith.constant 0 : index
    %c0_99 = arith.constant 0 : index
    %272 = vector.load %arg12[%c0_97, %c0_98, %c0_99] : memref<1x1x32xf32, #tpu.memory_space<vmem>>, vector<1x1x32xf32>
    %273 = vector.shape_cast %272 : vector<1x1x32xf32> to vector<1x32xf32>
    %274 = vector.broadcast %273 : vector<1x32xf32> to vector<16x32xf32>
    %275 = arith.addf %271, %274 : vector<16x32xf32>
    %276 = arith.truncf %275 : vector<16x32xf32> to vector<16x32xbf16>
    %c0_100 = arith.constant 0 : index
    %c0_101 = arith.constant 0 : index
    %c0_102 = arith.constant 0 : index
    %277 = vector.load %arg13[%c0_100, %c0_101, %c0_102] : memref<1x32x128xbf16, #tpu.memory_space<vmem>>, vector<1x32x128xbf16>
    %278 = vector.shape_cast %277 : vector<1x32x128xbf16> to vector<32x128xbf16>
    %cst_103 = arith.constant dense<0.000000e+00> : vector<16x128xf32>
    %279 = tpu.matmul %276, %278, %cst_103 {dimension_numbers = #tpu.dot_dimension_numbers<[1], [0], [0], [1], [0, 0, 1, 1], [], []>} : vector<16x32xbf16>, vector<32x128xbf16>, vector<16x128xf32> -> vector<16x128xf32>
    %c0_104 = arith.constant 0 : index
    %c0_105 = arith.constant 0 : index
    %c0_106 = arith.constant 0 : index
    %280 = vector.load %arg14[%c0_104, %c0_105, %c0_106] : memref<1x1x128xf32, #tpu.memory_space<vmem>>, vector<1x1x128xf32>
    %281 = vector.shape_cast %280 : vector<1x1x128xf32> to vector<1x128xf32>
    %282 = vector.broadcast %281 : vector<1x128xf32> to vector<16x128xf32>
    %283 = arith.addf %279, %282 : vector<16x128xf32>
    %284 = arith.negf %283 : vector<16x128xf32>
    %285 = math.exp %284 : vector<16x128xf32>
    %cst_107 = arith.constant 1.000000e+00 : f32
    %286 = vector.broadcast %cst_107 : f32 to vector<16x128xf32>
    %287 = arith.addf %286, %285 : vector<16x128xf32>
    %288 = arith.divf %286, %287 : vector<16x128xf32>
    %289 = arith.mulf %283, %288 : vector<16x128xf32>
    %290 = arith.truncf %289 : vector<16x128xf32> to vector<16x128xbf16>
    %c0_108 = arith.constant 0 : index
    %c0_109 = arith.constant 0 : index
    %c0_110 = arith.constant 0 : index
    %291 = vector.load %arg15[%c0_108, %c0_109, %c0_110] : memref<1x128x32xbf16, #tpu.memory_space<vmem>>, vector<1x128x32xbf16>
    %292 = vector.shape_cast %291 : vector<1x128x32xbf16> to vector<128x32xbf16>
    %cst_111 = arith.constant dense<0.000000e+00> : vector<16x32xf32>
    %293 = tpu.matmul %290, %292, %cst_111 {dimension_numbers = #tpu.dot_dimension_numbers<[1], [0], [0], [1], [0, 0, 1, 1], [], []>} : vector<16x128xbf16>, vector<128x32xbf16>, vector<16x32xf32> -> vector<16x32xf32>
    %c0_112 = arith.constant 0 : index
    %c0_113 = arith.constant 0 : index
    %c0_114 = arith.constant 0 : index
    %294 = vector.load %arg16[%c0_112, %c0_113, %c0_114] : memref<1x1x32xf32, #tpu.memory_space<vmem>>, vector<1x1x32xf32>
    %295 = vector.shape_cast %294 : vector<1x1x32xf32> to vector<1x32xf32>
    %296 = vector.broadcast %295 : vector<1x32xf32> to vector<16x32xf32>
    %297 = arith.addf %293, %296 : vector<16x32xf32>
    %298 = arith.mulf %297, %7 : vector<16x32xf32>
    %299 = arith.addf %249, %298 : vector<16x32xf32>
    %c0_115 = arith.constant 0 : index
    %c0_116 = arith.constant 0 : index
    %300 = vector.load %arg18[%c0_115, %c0_116] : memref<16x32xf32, #tpu.memory_space<vmem>>, vector<16x32xf32>
    tpu.vector_store %arg18[%c0_115, %c0_116], %299 {strides = array<i32>} : memref<16x32xf32, #tpu.memory_space<vmem>>, vector<16x32xf32>,
    %c1_i32 = arith.constant 1 : i32
    %301 = arith.cmpi eq, %arg0, %c1_i32 : i32
    %302 = arith.extui %301 : i1 to i32
    %c0_i32_117 = arith.constant 0 : i32
    %303 = arith.cmpi ne, %302, %c0_i32_117 : i32
    scf.if %303 {
      %c0_118 = arith.constant 0 : index
      %c0_119 = arith.constant 0 : index
      %304 = vector.load %arg17[%c0_118, %c0_119] : memref<16x32xf32, #tpu.memory_space<vmem>>, vector<16x32xf32>
      tpu.vector_store %arg17[%c0_118, %c0_119], %299 {strides = array<i32>} : memref<16x32xf32, #tpu.memory_space<vmem>>, vector<16x32xf32>,
    } else {
    }
    return
  }
  func.func @transform_0(%arg0: i32) -> (i32, i32, i32) {
    %c0_i32 = arith.constant 0 : i32
    %c0_i32_0 = arith.constant 0 : i32
    %c0_i32_1 = arith.constant 0 : i32
    return %arg0, %c0_i32, %c0_i32_0 : i32, i32, i32
  }
  func.func @transform_1(%arg0: i32) -> (i32, i32) {
    %c0_i32 = arith.constant 0 : i32
    %c0_i32_0 = arith.constant 0 : i32
    %c0_i32_1 = arith.constant 0 : i32
    return %c0_i32, %c0_i32_0 : i32, i32
  }
  func.func @transform_2(%arg0: i32) -> (i32, i32, i32) {
    %c0_i32 = arith.constant 0 : i32
    %c0_i32_0 = arith.constant 0 : i32
    %c0_i32_1 = arith.constant 0 : i32
    %c0_i32_2 = arith.constant 0 : i32
    return %c0_i32, %c0_i32_0, %c0_i32_1 : i32, i32, i32
  }
  func.func @transform_3(%arg0: i32) -> (i32, i32, i32) {
    %c0_i32 = arith.constant 0 : i32
    %c0_i32_0 = arith.constant 0 : i32
    %c0_i32_1 = arith.constant 0 : i32
    %c0_i32_2 = arith.constant 0 : i32
    return %c0_i32, %c0_i32_0, %c0_i32_1 : i32, i32, i32
  }
  func.func @transform_4(%arg0: i32) -> (i32, i32, i32) {
    %c0_i32 = arith.constant 0 : i32
    %c0_i32_0 = arith.constant 0 : i32
    %c0_i32_1 = arith.constant 0 : i32
    return %arg0, %c0_i32, %c0_i32_0 : i32, i32, i32
  }
  func.func @transform_5(%arg0: i32) -> (i32, i32, i32) {
    %c0_i32 = arith.constant 0 : i32
    %c0_i32_0 = arith.constant 0 : i32
    %c0_i32_1 = arith.constant 0 : i32
    return %arg0, %c0_i32, %c0_i32_0 : i32, i32, i32
  }
  func.func @transform_6(%arg0: i32) -> (i32, i32, i32) {
    %c0_i32 = arith.constant 0 : i32
    %c0_i32_0 = arith.constant 0 : i32
    %c0_i32_1 = arith.constant 0 : i32
    return %arg0, %c0_i32, %c0_i32_0 : i32, i32, i32
  }
  func.func @transform_7(%arg0: i32) -> (i32, i32, i32) {
    %c0_i32 = arith.constant 0 : i32
    %c0_i32_0 = arith.constant 0 : i32
    %c0_i32_1 = arith.constant 0 : i32
    return %arg0, %c0_i32, %c0_i32_0 : i32, i32, i32
  }
  func.func @transform_8(%arg0: i32) -> (i32, i32, i32) {
    %c0_i32 = arith.constant 0 : i32
    %c0_i32_0 = arith.constant 0 : i32
    %c0_i32_1 = arith.constant 0 : i32
    return %arg0, %c0_i32, %c0_i32_0 : i32, i32, i32
  }
  func.func @transform_9(%arg0: i32) -> (i32, i32, i32) {
    %c0_i32 = arith.constant 0 : i32
    %c0_i32_0 = arith.constant 0 : i32
    %c0_i32_1 = arith.constant 0 : i32
    return %arg0, %c0_i32, %c0_i32_0 : i32, i32, i32
  }
  func.func @transform_10(%arg0: i32) -> (i32, i32, i32) {
    %c0_i32 = arith.constant 0 : i32
    %c0_i32_0 = arith.constant 0 : i32
    %c0_i32_1 = arith.constant 0 : i32
    return %arg0, %c0_i32, %c0_i32_0 : i32, i32, i32
  }
  func.func @transform_11(%arg0: i32) -> (i32, i32, i32) {
    %c0_i32 = arith.constant 0 : i32
    %c0_i32_0 = arith.constant 0 : i32
    %c0_i32_1 = arith.constant 0 : i32
    return %arg0, %c0_i32, %c0_i32_0 : i32, i32, i32
  }
  func.func @transform_12(%arg0: i32) -> (i32, i32, i32) {
    %c0_i32 = arith.constant 0 : i32
    %c0_i32_0 = arith.constant 0 : i32
    %c0_i32_1 = arith.constant 0 : i32
    return %arg0, %c0_i32, %c0_i32_0 : i32, i32, i32
  }
  func.func @transform_13(%arg0: i32) -> (i32, i32, i32) {
    %c0_i32 = arith.constant 0 : i32
    %c0_i32_0 = arith.constant 0 : i32
    %c0_i32_1 = arith.constant 0 : i32
    return %arg0, %c0_i32, %c0_i32_0 : i32, i32, i32
  }
  func.func @transform_14(%arg0: i32) -> (i32, i32, i32) {
    %c0_i32 = arith.constant 0 : i32
    %c0_i32_0 = arith.constant 0 : i32
    %c0_i32_1 = arith.constant 0 : i32
    return %arg0, %c0_i32, %c0_i32_0 : i32, i32, i32
  }
  func.func @transform_15(%arg0: i32) -> (i32, i32, i32) {
    %c0_i32 = arith.constant 0 : i32
    %c0_i32_0 = arith.constant 0 : i32
    %c0_i32_1 = arith.constant 0 : i32
    return %arg0, %c0_i32, %c0_i32_0 : i32, i32, i32
  }
  func.func @transform_16(%arg0: i32) -> (i32, i32) {
    %c0_i32 = arith.constant 0 : i32
    %c0_i32_0 = arith.constant 0 : i32
    %c0_i32_1 = arith.constant 0 : i32
    return %c0_i32, %c0_i32_0 : i32, i32
  }
}

</mosaic_0001>

<bundles_post_ra>
// kernel: tpu_custom_call.1
= control target key start
LH: loop header
LB: loop body
LE: loop exit
PB: predicated region body
PF: predicated region fallthrough
CT: control target
= control target key end

     0   :  { %s3213_s0 = inlined_call_operand.vmem [shape: f32[2,16,64], index: 0, kind: input, shape index: {}]   ;;  %s3214_s1 = inlined_call_operand.vmem [shape: f32[16,32], index: 1, kind: input, shape index: {}]   ;;  %s3215_s2 = inlined_call_operand.vmem [shape: f32[2,1,8], index: 2, kind: input, shape index: {}]   ;;  %s3216_s3 = inlined_call_operand.vmem [shape: f32[2,8,1], index: 3, kind: input, shape index: {}]   ;;  %s3217_s4 = inlined_call_operand.vmem [shape: f32[2,1,32], index: 4, kind: input, shape index: {}]   ;;  %s3218_s5 = inlined_call_operand.vmem [shape: f32[2,1,32], index: 5, kind: input, shape index: {}]   ;;  %s3219_s6 = inlined_call_operand.vmem [shape: bf16[2,32,96], index: 6, kind: input, shape index: {}]   ;;  %s3220_s7 = inlined_call_operand.vmem [shape: f32[2,1,96], index: 7, kind: input, shape index: {}]   ;;  %s3221_s8 = inlined_call_operand.vmem [shape: bf16[2,32,32], index: 8, kind: input, shape index: {}]   ;;  %s3222_s9 = inlined_call_operand.vmem [shape: f32[2,1,32], index: 9, kind: input, shape index: {}]   ;;  %s3223_s10 = inlined_call_operand.vmem [shape: f32[2,1,32], index: 10, kind: input, shape index: {}]   ;;  %s3224_s11 = inlined_call_operand.vmem [shape: f32[2,1,32], index: 11, kind: input, shape index: {}]   ;;  %s3225_s12 = inlined_call_operand.vmem [shape: bf16[2,32,128], index: 12, kind: input, shape index: {}]   ;;  %s3226_s13 = inlined_call_operand.vmem [shape: f32[2,1,128], index: 13, kind: input, shape index: {}]   ;;  %s3227_s14 = inlined_call_operand.vmem [shape: bf16[2,128,32], index: 14, kind: input, shape index: {}]   ;;  %s3228_s15 = inlined_call_operand.vmem [shape: f32[2,1,32], index: 15, kind: input, shape index: {}]   ;;  %s3229_s16 = inlined_call_operand.hbm [shape: f32[16,32], index: 16, kind: output, shape index: {}]  }
   0x1   :  { %3236 = sst [smem:[#allocation10_spill]] %s3213_s0 }
   0x2   :  { %3237 = sst [smem:[#allocation11_spill]] %s3214_s1 }
   0x3   :  { %3238 = sst [smem:[#allocation12_spill]] %s3215_s2 }
   0x4   :  { %3239 = sst [smem:[#allocation13_spill]] %s3216_s3 }
   0x5   :  { %3240 = sst [smem:[#allocation14_spill]] %s3219_s6 }
   0x6   :  { %3241 = sst [smem:[#allocation15_spill]] %s3221_s8 }
   0x7   :  { %3242 = sst [smem:[#allocation16_spill]] %s3229_s16 }
   0x8   :  { %21 = vsyncpa [#allocation6], 0  ;;  %s2812_s21 = smov 0  }
   0x9 LB: > { %3243 = sst [smem:[#allocation8_spill]] %s2705_s21  ;;  %s2818_s22 = sadd.s32 4294967295, %s2705_s21   ;;  %s2705_s21 = sphi %s2812_s21, %s27_s21  }
   0xa   : > { %p2315_p0 = scmp.ge.s32.totalorder %s2705_s21, 1  ;;  %p562_p1 = scmp.lt.s32.totalorder %s2705_s21, 3 }
   0xc   : > { %p563_p2 = pnand %p2315_p0, %p562_p1 }
   0xe   : > { %566 = sbr.rel (%p563_p2) target bundleno = 2695 (0xa87), region = 84 }
  0x15   : > { %p651_p3 = scmp.lt.s32.totalorder %s2818_s22, 1  ;;  %s3244_s30 = sld [smem:[#allocation10_spill]] }
  0x16   : > { %s3246_s6 = sld [smem:[#allocation14_spill]]  ;;  %s3247_s8 = sld [smem:[#allocation15_spill]] }
  0x17   : > { %s2824_s23 = scalar_select %p651_p3, %s2818_s22, 1 }
  0x18   : > { %p2326_p4 = scmp.ne.s32.totalorder %s2818_s22, 0 }
  0x19   : > { %s2377_s24 = sshll.u32 %s2824_s23, 4  ;;  %s691_s3 = scalar_lea.vmem %s3226_s13, %s2824_s23  ;;  %v2707_v1 = vmov (!%p2326_p4), 0   ;;  %vm707_vm0 = vcmask (!%p2326_p4), 261120   ;;  %v738_v5 = vlaneseq (!%p2326_p4)  ;;  %vm747_vm2 = vcmask (!%p2326_p4), 64512  }
  0x1a   : > { %s2869_s2 = scalar_lea.vmem %s3225_s12, %s2377_s24  ;;  %704 = sbr.rel (%p2326_p4) target bundleno = 175 (0xaf), region = 88  ;;  %2606 = vset.pattern.permute.xlu0 (!%p2326_p4), %v2707_v1  ;;  %v2708_v13 = vmov (!%p2326_p4), -1e+30  }
  0x1b   : > { %s2834_s0 = scalar_lea.vmem %s3244_s30, %s2377_s24  ;;  %s699_s30 = scalar_lea.vmem %s3228_s15, %s2824_s23  ;;  %v739_v6 = vand.u32 (!%p2326_p4), 127, %v738_v5 }
  0x1c   : > { %3245 = sst [smem:[#allocation9_spill]] %s2834_s0  ;;  %s2843_s16 = scalar_lea.vmem %s3246_s6, %s2377_s24 }
  0x1d   : > { %s2852_s27 = scalar_lea.vmem %s3247_s8, %s2377_s24  ;;  %s683_s6 = scalar_lea.vmem %s3224_s11, %s2824_s23  ;;  %vm740_vm1 = vcmp.eq.s32.totalorder (!%p2326_p4), %v739_v6, 0 }
  0x1e   : > { %s2381_s8 = sshll.u32 %s2824_s23, 6  ;;  %s3248_s21 = sld [smem:[#allocation13_spill]] (!%p2326_p4) }
  0x1f   : > { %s2883_s19 = scalar_lea.vmem %s3227_s14, %s2381_s8  ;;  %s3250_s29 = sld [smem:[#allocation11_spill]] (!%p2326_p4) }
  0x20   : > { %s3251_s24 = sld [smem:[#allocation12_spill]] (!%p2326_p4) }
  0x24   : > { %s3249_s20 = smov %s3248_s21  ;;  %v712_v0 = vld [vmem:[%s3248_s21] sm:$0xff] }
  0x25   : > { %716 = vperm.xlu0 %2606, %v712_v0   ;;  %v713_v2 = vld [vmem:[%s3249_s20 + $0x8] sm:$0xff]  ;;  %v705_v3 = vld [vmem:[%s3250_s29] sm:$0xff] }
  0x26   : > { %v706_v4 = vld [vmem:[%s3250_s29 + $0x8] sm:$0xff]  ;;  %708 = vst.msk [vmem:[#allocation2] sm:$0xff] %vm707_vm0, %v705_v3  ;;  %v2327_v7 = vld [vmem:[%s3251_s24] ss:$0 sm:$0xff]  ;;  %v2328_v10 = vld [vmem:[%s3251_s24 + $0x1] ss:$0 sm:$0xff] }
  0x27   : > { %709 = vst.msk [vmem:[#allocation2 + $0x8] sm:$0xff] %vm707_vm0, %v706_v4 }
  0x29   : > { %721 = vperm.xlu0 %2606, %v713_v2  }
  0xa4   : > { %v717_v8 = vpop.permute.xlu0 %716 }
  0xa5   : > { %v736_v9 = vmul.f32 %v2327_v7, %v717_v8 }
  0xa7   : > { %v741_v11 = vsel %vm740_vm1, 1.0, %v736_v9 }
  0xa8   : > { %vm743_vm3 = vcmp.gt.f32.partialorder %v741_v11, 0.5  ;;  %v722_v12 = vpop.permute.xlu0 %721 }
  0xa9   : > { %v745_v14 = vsel %vm743_vm3, 0.0, %v2708_v13  ;;  %v737_v15 = vmul.f32 %v2328_v10, %v722_v12 }
  0xaa   : > { %748 = vst.msk [vmem:[#allocation3] sm:$0xff] %vm747_vm2, %v745_v14 }
  0xab   : > { %v742_v16 = vsel %vm740_vm1, 1.0, %v737_v15 }
  0xac   : > { %vm744_vm4 = vcmp.gt.f32.partialorder %v742_v16, 0.5 }
  0xad   : > { %v746_v17 = vsel %vm744_vm4, 0.0, %v2708_v13 }
  0xae   : > { %749 = vst.msk [vmem:[#allocation3 + $0x8] sm:$0xff] %vm747_vm2, %v746_v17 }
  0xaf PF: > { %v2904_v18 = vld [vmem:[#allocation2] sm:$0xff]  ;;  %vm754_vm5 = vcmask 261120   ;;  %v2906_v19 = vld [vmem:[#allocation2 + $0x8] sm:$0xff]  ;;  %v2709_v33 = vmov 0.0   ;;  %vm2710_vm6 = vmmov 0   ;;  %s3252_s26 = scalar_lea.vmem %s3217_s4, %s2824_s23  ;;  %s3253_s17 = scalar_lea.vmem %s3218_s5, %s2824_s23  ;;  %vm875_vm7 = vcmask 64512  }
  0xb0   : > { %v755_v20 = vsel %vm754_vm5, %v2904_v18, 0.0  ;;  %v758_v21 = vsel %vm754_vm5, %v2906_v19, 0.0  ;;  %v2607_v32 = vld [vmem:[%s2843_s16] sm:$0xff]   ;;  %2432 = vmatprep.subr.bf16.mxu0 %v2709_v33  ;;  %2452 = vmatprep.subr.bf16.mxu1 %v2709_v33  ;;  %v2608_v34 = vld [vmem:[%s2843_s16 + $0x8] sm:$0xff]   ;;  %s3254_s21 = scalar_lea.vmem %s3220_s7, %s2824_s23  ;;  %s2711_s1 = smov 88   ;;  %vm937_vm8 = vcmask 1043456  }
  0xb1   : > { %756 = vadd.xlane.f32.xlu0 %v755_v20  ;;  %2433 = vmatpush3.bf16.msra.mxu0 %v2607_v32  ;;  %v2329_v43 = vld [vmem:[%s3252_s26] ss:$0 sm:$0xff]  ;;  %s2712_s16 = smov 96   ;;  %s2713_s25 = smov 112   ;;  %vm984_vm9 = vcmask 60416   ;;  %vm1456_vm10 = vcmask 64516  }
  0xb2   : > { %2436 = vmatprep.mubr.msk.bf16.mxu0 %vm2710_vm6, %v2709_v33  ;;  %2434 = vmatprep.subr.bf16.mxu0 %v2709_v33  ;;  %v2330_v47 = vld [vmem:[%s3253_s17] ss:$0 sm:$0xff]  ;;  %s2714_s26 = smov 120   ;;  %s2715_s28 = smov 104   ;;  %vm1102_vm11 = vcmask 126016   ;;  %vm1219_vm12 = vcmask 191616  }
  0xb3   : > { %2454 = vmatprep.mubr.msk.bf16.mxu1 %vm2710_vm6, %v2709_v33  ;;  %v2331_v52 = vld [vmem:[%s3254_s21] ss:$0 sm:$0xff]  ;;  %s2716_s8 = smov 80   ;;  %s2717_s17 = smov 72   ;;  %vm1336_vm13 = vcmask 257216   ;;  %vm1575_vm14 = vcmask 130116  }
  0xb4   : > { %s2718_s18 = smov 64   ;;  %s2719_s0 = smov 48   ;;  %vm1693_vm15 = vcmask 195716   ;;  %vm1811_vm0 = vcmask 261316  }
  0xb5   : > { %759 = vadd.xlane.f32.xlu0 %v758_v21  ;;  %2435 = vmatpush3.bf16.msra.mxu0 %v2608_v34  ;;  %s2720_s21 = smov 56   ;;  %p2372_p5 = scmp.ne.s32.totalorder %s2818_s22, 1 }
  0xb6   : > { %2440 = vmatprep.subr.bf16.mxu0 %v2709_v33 }
 0x13e   : > { %v757_v22 = vpop.xlane.xlu0 %756 }
 0x13f   : > { %v762_v23 = vmul.f32 0.03125, %v757_v22 }
 0x141   : > { %v764_v24 = vsub.f32 %v2904_v18, %v762_v23 }
 0x142   : > { %v760_v25 = vpop.xlane.xlu0 %759 }
 0x143   : > { %v763_v26 = vmul.f32 0.03125, %v760_v25  ;;  %v766_v27 = vmul.f32 %v764_v24, %v764_v24 }
 0x145   : > { %v765_v28 = vsub.f32 %v2906_v19, %v763_v26  ;;  %v768_v29 = vsel %vm754_vm5, %v766_v27, 0.0  ;;  %v868_v27 = vld [vmem:[#allocation3] sm:$0xff] }
 0x146   : > { %769 = vadd.xlane.f32.xlu1 %v768_v29 }
 0x147   : > { %v767_v30 = vmul.f32 %v765_v28, %v765_v28 }
 0x149   : > { %v771_v31 = vsel %vm754_vm5, %v767_v30, 0.0 }
 0x14a   : > { %772 = vadd.xlane.f32.xlu1 %v771_v31 }
 0x1d3   : > { %v770_v35 = vpop.xlane.xlu1 %769 }
 0x1d4   : > { %v774_v36 = vmul.f32 0.03125, %v770_v35 }
 0x1d6   : > { %v776_v37 = vadd.f32 1e-06, %v774_v36 }
 0x1d7   : > { %v773_v38 = vpop.xlane.xlu1 %772 }
 0x1d8   : > { %2621 = vrsqrt.f32 %v776_v37  ;;  %v775_v39 = vmul.f32 0.03125, %v773_v38 }
 0x1da   : > { %v777_v40 = vadd.f32 1e-06, %v775_v39 }
 0x1dc   : > { %2623 = vrsqrt.f32 %v777_v40 }
 0x1e2   : > { %v2622_v41 = vpop.eup %2621 }
 0x1e3   : > { %v780_v42 = vmul.f32 %v2622_v41, %v764_v24 }
 0x1e5   : > { %v789_v46 = vmul.f32 %v2329_v43, %v780_v42 }
 0x1e6   : > { %v2624_v44 = vpop.eup %2623 }
 0x1e7   : > { %v781_v45 = vmul.f32 %v2624_v44, %v765_v28  ;;  %v798_v49 = vadd.f32 %v2330_v47, %v789_v46 }
 0x1e9   : > { %v790_v48 = vmul.f32 %v2329_v43, %v781_v45 }
 0x1eb   : > { %v799_v50 = vadd.f32 %v2330_v47, %v790_v48 }
 0x1ed   : > { %v800_v51 = vpack.c.bf16 %v799_v50, %v798_v49 }
 0x1ef   : > { %2437 = vmatmul.mubr.msk.bf16.vlgmr.msra.gmra.mrb[0].mxu0 %vm754_vm5, %v800_v51 }
 0x1f0   : > { %2442 = vmatprep.mubr.msk.bf16.mxu0 %vm2710_vm6, %v2709_v33 }
 0x2c2   : > { %v861_v53 = vpop.f32.mrb[0].mxu0 }
 0x2c3   : > { %v862_v54 = vadd.f32 %v2331_v52, %v861_v53  ;;  %v2438_v55 = vpop.f32.mrb[1].mxu0 }
 0x2c4   : > { %v864_v56 = vpop.f32.mrb[2].mxu0 }
 0x2c5   : > { %v869_v57 = vmul.f32 0.35355338, %v862_v54  ;;  %v2944_v58 = vpack.c.bf16 %v862_v54, %v862_v54  ;;  %v2439_v59 = vpop.f32.mrb[3].mxu0  ;;  %v865_v61 = vadd.f32 %v2331_v52, %v864_v56 }
 0x2c7   : > { %989 = vrot.lane.b32.xlu1 %v2944_v58, %s2711_s1  ;;  %873 = vrot.lane.b32.xlu0 %v2944_v58, %s2712_s16  ;;  %v870_v60 = vpack.c.bf16 %v869_v57, %v869_v57  ;;  %v2950_v62 = vpack.c.bf16 %v865_v61, %v865_v61  ;;  %v1340_v63 = vmul.f32 0.35355338, %v865_v61 }
 0x2c9   : > { %v1341_v0 = vpack.c.bf16 %v1340_v63, %v1340_v63 }
 0x2cb   : > { %1104 = vrot.lane.b32.xlu0 %v870_v60, %s2713_s25  ;;  %987 = vrot.lane.b32.xlu1 %v870_v60, %s2714_s26 }
 0x2cf   : > { %1221 = vrot.lane.b32.xlu0 %v870_v60, %s2715_s28  ;;  %1106 = vrot.lane.b32.xlu1 %v2944_v58, %s2716_s8 }
 0x2d3   : > { %1223 = vrot.lane.b32.xlu1 %v2944_v58, %s2717_s17  ;;  %1461 = vrot.lane.b32.xlu0 %v2950_v62, %s2711_s1  ;;  %s2721_s1 = smov 40  }
 0x2d7   : > { %1579 = vrot.lane.b32.xlu0 %v2950_v62, %s2716_s8  ;;  %1344 = vrot.lane.b32.xlu1 %v2950_v62, %s2712_s16 }
 0x2db   : > { %1697 = vrot.lane.b32.xlu0 %v2950_v62, %s2717_s17  ;;  %1459 = vrot.lane.b32.xlu1 %v1341_v0, %s2714_s26  ;;  %s2723_s26 = smov 24  }
 0x2df   : > { %932 = vrot.lane.b32.xlu0 %v2944_v58, %s2718_s18  ;;  %1577 = vrot.lane.b32.xlu1 %v1341_v0, %s2713_s25  ;;  %s2722_s25 = smov 8  }
 0x2e3   : > { %1164 = vrot.lane.b32.xlu0 %v2944_v58, %s2719_s0  ;;  %1695 = vrot.lane.b32.xlu1 %v1341_v0, %s2715_s28  ;;  %s2724_s28 = smov 16  }
 0x2e7   : > { %1047 = vrot.lane.b32.xlu1 %v2944_v58, %s2720_s21 }
 0x339   : > { %v990_v1 = vpop.permute.xlu1 %989  ;;  %v874_v2 = vpop.permute.xlu0 %873 }
 0x33a   : > { %v880_v3 = vsel %vm875_vm7, %v874_v2, 0  ;;  %v995_v4 = vsel %vm875_vm7, %v990_v1, 0 }
 0x33b   : > { %2441 = vmatpush3.bf16.xpose.msra.mxu0 %v880_v3  ;;  %2453 = vmatpush3.bf16.xpose.msra.mxu1 %v995_v4  ;;  %v1339_v4 = vld [vmem:[#allocation3 + $0x8] sm:$0xff] }
 0x33c   : > { %2464 = vmatprep.subr.bf16.mxu1 %v2709_v33  ;;  %2446 = vmatprep.subr.bf16.mxu0 %v2709_v33 }
 0x33d   : > { %v1105_v5 = vpop.permute.xlu0 %1104  ;;  %v988_v6 = vpop.permute.xlu1 %987 }
 0x341   : > { %v1222_v7 = vpop.permute.xlu0 %1221  ;;  %v1107_v8 = vpop.permute.xlu1 %1106 }
 0x342   : > { %v1112_v9 = vsel %vm875_vm7, %v1107_v8, 0  ;;  %2443 = vmatmul.mubr.msk.bf16.vlgmr.msra.gmra.mrb[4].mxu0 %vm875_vm7, %v870_v60  ;;  %2455 = vmatmul.mubr.msk.bf16.vlgmr.msra.gmra.mrb[0].mxu1 %vm875_vm7, %v988_v6 }
 0x343   : > { %2465 = vmatpush3.bf16.xpose.msra.mxu1 %v1112_v9  ;;  %2466 = vmatprep.mubr.msk.bf16.mxu1 %vm2710_vm6, %v2709_v33 }
 0x344   : > { %2476 = vmatprep.subr.bf16.mxu1 %v2709_v33  ;;  %2448 = vmatprep.mubr.msk.bf16.mxu0 %vm2710_vm6, %v2709_v33 }
 0x345   : > { %v1462_v10 = vpop.permute.xlu0 %1461  ;;  %v1224_v11 = vpop.permute.xlu1 %1223 }
 0x346   : > { %v1229_v13 = vsel %vm875_vm7, %v1224_v11, 0  ;;  %v1467_v21 = vsel %vm875_vm7, %v1462_v10, 0 }
 0x349   : > { %v1580_v12 = vpop.permute.xlu0 %1579  ;;  %v1345_v15 = vpop.permute.xlu1 %1344 }
 0x34a   : > { %2467 = vmatmul.mubr.msk.bf16.vlgmr.msra.gmra.mrb[4].mxu1 %vm875_vm7, %v1105_v5  ;;  %v1350_v17 = vsel %vm875_vm7, %v1345_v15, 0  ;;  %v1585_v23 = vsel %vm875_vm7, %v1580_v12, 0 }
 0x34b   : > { %2477 = vmatpush3.bf16.xpose.msra.mxu1 %v1229_v13  ;;  %2478 = vmatprep.mubr.msk.bf16.mxu1 %vm2710_vm6, %v2709_v33 }
 0x34c   : > { %2488 = vmatprep.subr.bf16.mxu1 %v2709_v33 }
 0x34d   : > { %v1698_v14 = vpop.permute.xlu0 %1697  ;;  %v1460_v22 = vpop.permute.xlu1 %1459 }
 0x34e   : > { %v1703_v25 = vsel %vm875_vm7, %v1698_v14, 0 }
 0x351   : > { %v933_v16 = vpop.permute.xlu0 %932  ;;  %v1578_v24 = vpop.permute.xlu1 %1577 }
 0x352   : > { %v939_v20 = vsel %vm937_vm8, %v933_v16, 0  ;;  %2479 = vmatmul.mubr.msk.bf16.vlgmr.msra.gmra.mrb[8].mxu1 %vm875_vm7, %v1222_v7 }
 0x353   : > { %2447 = vmatpush3.bf16.msra.mxu0 %v939_v20  ;;  %2489 = vmatpush3.bf16.xpose.msra.mxu1 %v1350_v17 }
 0x354   : > { %2490 = vmatprep.mubr.msk.bf16.mxu1 %vm2710_vm6, %v2709_v33  ;;  %2500 = vmatprep.subr.bf16.mxu1 %v2709_v33 }
 0x355   : > { %2458 = vmatprep.subr.bf16.mxu0 %v2709_v33  ;;  %v1696_v26 = vpop.permute.xlu1 %1695  ;;  %v1165_v15 = vpop.permute.xlu0 %1164 }
 0x359   : > { %v1048_v16 = vpop.permute.xlu1 %1047 }
 0x35a   : > { %2491 = vmatmul.mubr.msk.bf16.vlgmr.msra.gmra.mrb[12].mxu1 %vm875_vm7, %v1341_v0 }
 0x35b   : > { %2501 = vmatpush3.bf16.xpose.msra.mxu1 %v1467_v21  ;;  %2502 = vmatprep.mubr.msk.bf16.mxu1 %vm2710_vm6, %v2709_v33 }
 0x35c   : > { %2512 = vmatprep.subr.bf16.mxu1 %v2709_v33 }
 0x362   : > { %2503 = vmatmul.mubr.msk.bf16.vlgmr.msra.gmra.mrb[16].mxu1 %vm875_vm7, %v1460_v22 }
 0x363   : > { %2513 = vmatpush3.bf16.xpose.msra.mxu1 %v1585_v23  ;;  %2514 = vmatprep.mubr.msk.bf16.mxu1 %vm2710_vm6, %v2709_v33 }
 0x364   : > { %2524 = vmatprep.subr.bf16.mxu1 %v2709_v33 }
 0x36a   : > { %2515 = vmatmul.mubr.msk.bf16.vlgmr.msra.gmra.mrb[20].mxu1 %vm875_vm7, %v1578_v24 }
 0x36b   : > { %2525 = vmatpush3.bf16.xpose.msra.mxu1 %v1703_v25  ;;  %2526 = vmatprep.mubr.msk.bf16.mxu1 %vm2710_vm6, %v2709_v33 }
 0x36c   : > { %2536 = vmatprep.subr.bf16.mxu1 %v2709_v33 }
 0x372   : > { %2527 = vmatmul.mubr.msk.bf16.vlgmr.msra.gmra.mrb[24].mxu1 %vm875_vm7, %v1696_v26 }
 0x373   : > { %2540 = vmatprep.mubr.msk.bf16.mxu1 %vm2710_vm6, %v2709_v33 }
 0x415   : > { %v916_v28 = vpop.f32.mrb[4].mxu0  ;;  %v1031_v29 = vpop.f32.mrb[0].mxu1 }
 0x416   : > { %v3006_v30 = vadd.f32 %v916_v28, %v868_v27  ;;  %v3008_v31 = vadd.f32 %v1031_v29, %v868_v27  ;;  %v2444_v32 = vpop.f32.mrb[5].mxu0  ;;  %v2456_v34 = vpop.f32.mrb[1].mxu1 }
 0x417   : > { %v919_v35 = vpop.f32.mrb[6].mxu0  ;;  %v1034_v36 = vpop.f32.mrb[2].mxu1 }
 0x418   : > { %v2445_v37 = vpop.f32.mrb[7].mxu0  ;;  %v2457_v38 = vpop.f32.mrb[3].mxu1  ;;  %v1037_v39 = vsel %vm875_vm7, %v3008_v31, -inf  ;;  %v922_v40 = vsel %vm875_vm7, %v3006_v30, -inf }
 0x419   : > { %1038 = vmax.xlane.f32.xlu1 %v1037_v39  ;;  %923 = vmax.xlane.f32.xlu0 %v922_v40  ;;  %v1170_v37 = vsel %vm937_vm8, %v1165_v15, 0 }
 0x41d   : > { %v1148_v41 = vpop.f32.mrb[4].mxu1 }
 0x41e   : > { %v1149_v42 = vadd.f32 %v1148_v41, %v868_v27  ;;  %v2468_v43 = vpop.f32.mrb[5].mxu1 }
 0x41f   : > { %v1151_v44 = vpop.f32.mrb[6].mxu1 }
 0x420   : > { %v2469_v45 = vpop.f32.mrb[7].mxu1  ;;  %v1154_v46 = vsel %vm875_vm7, %v1149_v42, -inf }
 0x421   : > { %1155 = vmax.xlane.f32.xlu0 %v1154_v46 }
 0x425   : > { %v1265_v47 = vpop.f32.mrb[8].mxu1 }
 0x426   : > { %v3015_v48 = vadd.f32 %v1265_v47, %v868_v27  ;;  %v2480_v49 = vpop.f32.mrb[9].mxu1 }
 0x427   : > { %v1268_v50 = vpop.f32.mrb[10].mxu1 }
 0x428   : > { %v2481_v51 = vpop.f32.mrb[11].mxu1  ;;  %v1271_v52 = vsel %vm875_vm7, %v3015_v48, -inf }
 0x429   : > { %1272 = vmax.xlane.f32.xlu0 %v1271_v52 }
 0x42a   : > { %1402 = vrot.lane.b32.xlu1 %v2950_v62, %s2718_s18  ;;  %s3256_s18 = scalar_lea.vmem %s3222_s9, %s2824_s23 }
 0x42d   : > { %v1386_v53 = vpop.f32.mrb[12].mxu1 }
 0x42e   : > { %v2492_v54 = vpop.f32.mrb[13].mxu1  ;;  %v3022_v8 = vadd.f32 %v1386_v53, %v1339_v4 }
 0x42f   : > { %v1389_v55 = vpop.f32.mrb[14].mxu1 }
 0x430   : > { %v2493_v56 = vpop.f32.mrb[15].mxu1  ;;  %v1392_v10 = vsel %vm875_vm7, %v3022_v8, -inf }
 0x435   : > { %v1503_v57 = vpop.f32.mrb[16].mxu1 }
 0x436   : > { %v2504_v59 = vpop.f32.mrb[17].mxu1  ;;  %v3024_v9 = vadd.f32 %v1503_v57, %v1339_v4 }
 0x437   : > { %v1506_v60 = vpop.f32.mrb[18].mxu1 }
 0x438   : > { %v2505_v61 = vpop.f32.mrb[19].mxu1  ;;  %v1509_v11 = vsel %vm875_vm7, %v3024_v9, -inf }
 0x43d   : > { %v1621_v63 = vpop.f32.mrb[20].mxu1 }
 0x43e   : > { %v2516_v0 = vpop.f32.mrb[21].mxu1  ;;  %v3030_v12 = vadd.f32 %v1621_v63, %v1339_v4 }
 0x43f   : > { %v1624_v1 = vpop.f32.mrb[22].mxu1  ;;  %1281 = vrot.lane.b32.xlu0 %v2944_v58, %s2721_s1 }
 0x440   : > { %v2517_v2 = vpop.f32.mrb[23].mxu1  ;;  %v1627_v58 = vsel %vm875_vm7, %v3030_v12, -inf }
 0x445   : > { %v1739_v3 = vpop.f32.mrb[24].mxu1 }
 0x446   : > { %v2528_v5 = vpop.f32.mrb[25].mxu1  ;;  %v3038_v13 = vadd.f32 %v1739_v3, %v1339_v4 }
 0x447   : > { %v1742_v6 = vpop.f32.mrb[26].mxu1 }
 0x448   : > { %v2529_v7 = vpop.f32.mrb[27].mxu1  ;;  %v1745_v14 = vsel %vm875_vm7, %v3038_v13, -inf }
 0x44e   : > { %1393 = vmax.xlane.f32.xlu1 %v1392_v10 }
 0x452   : > { %1510 = vmax.xlane.f32.xlu1 %v1509_v11 }
 0x45e   : > { %1628 = vmax.xlane.f32.xlu0 %v1627_v58 }
 0x463   : > { %1519 = vrot.lane.b32.xlu1 %v2950_v62, %s2720_s21 }
 0x474   : > { %1637 = vrot.lane.b32.xlu0 %v2950_v62, %s2719_s0 }
 0x487   : > { %1746 = vmax.xlane.f32.xlu1 %v1745_v14 }
 0x498   : > { %1755 = vrot.lane.b32.xlu1 %v2950_v62, %s2721_s1 }
 0x4a6   : > { %v1039_v17 = vpop.xlane.xlu1 %1038  ;;  %v924_v20 = vpop.xlane.xlu0 %923 }
 0x4a7   : > { %v1040_v21 = vsub.f32 %v3008_v31, %v1039_v17  ;;  %v925_v22 = vsub.f32 %v3006_v30, %v924_v20  ;;  %v1053_v31 = vsel %vm937_vm8, %v1048_v16, 0 }
 0x4a9   : > { %v1041_v23 = vmul.f32 1.442695, %v1040_v21  ;;  %v926_v24 = vmul.f32 1.442695, %v925_v22 }
 0x4aa   : > { %v1403_v43 = vpop.permute.xlu1 %1402 }
 0x4ab   : > { %2625 = vpow2.f32 %v1041_v23  ;;  %v1408_v45 = vsel %vm937_vm8, %v1403_v43, 0 }
 0x4ac   : > { %2627 = vpow2.f32 %v926_v24 }
 0x4ae   : > { %v1156_v25 = vpop.xlane.xlu0 %1155 }
 0x4af   : > { %v1157_v26 = vsub.f32 %v1149_v42, %v1156_v25 }
 0x4b1   : > { %v1158_v29 = vmul.f32 1.442695, %v1157_v26 }
 0x4b3   : > { %2629 = vpow2.f32 %v1158_v29 }
 0x4b5   : > { %v2626_v27 = vpop.eup %2625 }
 0x4b6   : > { %v3045_v28 = vpop.eup %2627  ;;  %v1043_v62 = vsel %vm875_vm7, %v2626_v27, 0.0  ;;  %v1273_v32 = vpop.xlane.xlu0 %1272  ;;  %v1046_v36 = vpack.c.bf16 %v2626_v27, %v2626_v27 }
 0x4b7   : > { %1044 = vadd.xlane.f32.xlu0 %v1043_v62  ;;  %v931_v34 = vpack.c.bf16 %v3045_v28, %v3045_v28  ;;  %v1274_v30 = vsub.f32 %v3015_v48, %v1273_v32  ;;  %v928_v6 = vsel %vm875_vm7, %v3045_v28, 0.0 }
 0x4b9   : > { %2449 = vmatmul.mubr.msk.bf16.vlgmr.msra.gmra.mrb[8].mxu0 %vm875_vm7, %v931_v34  ;;  %v1275_v35 = vmul.f32 1.442695, %v1274_v30 }
 0x4ba   : > { %2459 = vmatpush3.bf16.msra.mxu0 %v1053_v31  ;;  %2460 = vmatprep.mubr.msk.bf16.mxu0 %vm2710_vm6, %v2709_v33  ;;  %v1282_v39 = vpop.permute.xlu0 %1281 }
 0x4bb   : > { %2470 = vmatprep.subr.bf16.mxu0 %v2709_v33  ;;  %2631 = vpow2.f32 %v1275_v35  ;;  %v1287_v41 = vsel %vm937_vm8, %v1282_v39, 0 }
 0x4bd   : > { %v3061_v38 = vpop.eup %2629 }
 0x4be   : > { %v1163_v40 = vpack.c.bf16 %v3061_v38, %v3061_v38 }
 0x4c1   : > { %2461 = vmatmul.mubr.msk.bf16.vlgmr.msra.gmra.mrb[12].mxu0 %vm875_vm7, %v1046_v36 }
 0x4c2   : > { %2471 = vmatpush3.bf16.msra.mxu0 %v1170_v37  ;;  %2472 = vmatprep.mubr.msk.bf16.mxu0 %vm2710_vm6, %v2709_v33 }
 0x4c3   : > { %2482 = vmatprep.subr.bf16.mxu0 %v2709_v33 }
 0x4c5   : > { %v2632_v42 = vpop.eup %2631 }
 0x4c6   : > { %v1280_v44 = vpack.c.bf16 %v2632_v42, %v2632_v42  ;;  %v1277_v5 = vsel %vm875_vm7, %v2632_v42, 0.0 }
 0x4c9   : > { %2473 = vmatmul.mubr.msk.bf16.vlgmr.msra.gmra.mrb[16].mxu0 %vm875_vm7, %v1163_v40 }
 0x4ca   : > { %2483 = vmatpush3.bf16.msra.mxu0 %v1287_v41  ;;  %2484 = vmatprep.mubr.msk.bf16.mxu0 %vm2710_vm6, %v2709_v33 }
 0x4cb   : > { %2494 = vmatprep.subr.bf16.mxu0 %v2709_v33 }
 0x4d1   : > { %2485 = vmatmul.mubr.msk.bf16.vlgmr.msra.gmra.mrb[20].mxu0 %vm875_vm7, %v1280_v44 }
 0x4d2   : > { %2495 = vmatpush3.bf16.msra.mxu0 %v1408_v45  ;;  %2496 = vmatprep.mubr.msk.bf16.mxu0 %vm2710_vm6, %v2709_v33 }
 0x4d3   : > { %2506 = vmatprep.subr.bf16.mxu0 %v2709_v33 }
 0x4db   : > { %v1394_v46 = vpop.xlane.xlu1 %1393 }
 0x4dc   : > { %v1395_v47 = vsub.f32 %v3022_v8, %v1394_v46 }
 0x4de   : > { %v1396_v48 = vmul.f32 1.442695, %v1395_v47 }
 0x4df   : > { %v1511_v49 = vpop.xlane.xlu1 %1510 }
 0x4e0   : > { %2633 = vpow2.f32 %v1396_v48  ;;  %v1512_v50 = vsub.f32 %v3024_v9, %v1511_v49 }
 0x4e2   : > { %v1513_v51 = vmul.f32 1.442695, %v1512_v50 }
 0x4e3   : > { %v1520_v53 = vpop.permute.xlu1 %1519 }
 0x4e4   : > { %2635 = vpow2.f32 %v1513_v51  ;;  %v1525_v57 = vsel %vm937_vm8, %v1520_v53, 0 }
 0x4ea   : > { %v2634_v52 = vpop.eup %2633 }
 0x4eb   : > { %v1629_v54 = vpop.xlane.xlu0 %1628  ;;  %v1401_v55 = vpack.c.bf16 %v2634_v52, %v2634_v52  ;;  %v1398_v15 = vsel %vm875_vm7, %v2634_v52, 0.0 }
 0x4ec   : > { %v1630_v56 = vsub.f32 %v3030_v12, %v1629_v54 }
 0x4ed   : > { %2497 = vmatmul.mubr.msk.bf16.vlgmr.msra.gmra.mrb[24].mxu0 %vm875_vm7, %v1401_v55 }
 0x4ee   : > { %v2636_v59 = vpop.eup %2635  ;;  %v1631_v60 = vmul.f32 1.442695, %v1630_v56  ;;  %2507 = vmatpush3.bf16.msra.mxu0 %v1525_v57  ;;  %2508 = vmatprep.mubr.msk.bf16.mxu0 %vm2710_vm6, %v2709_v33 }
 0x4ef   : > { %v1515_v61 = vsel %vm875_vm7, %v2636_v59, 0.0  ;;  %2518 = vmatprep.subr.bf16.mxu0 %v2709_v33  ;;  %v1638_v63 = vpop.permute.xlu0 %1637  ;;  %v1518_v0 = vpack.c.bf16 %v2636_v59, %v2636_v59 }
 0x4f0   : > { %2637 = vpow2.f32 %v1631_v60  ;;  %1516 = vadd.xlane.f32.xlu0 %v1515_v61  ;;  %v1643_v1 = vsel %vm937_vm8, %v1638_v63, 0 }
 0x4f5   : > { %2509 = vmatmul.mubr.msk.bf16.vlgmr.msra.gmra.mrb[28].mxu0 %vm875_vm7, %v1518_v0 }
 0x4f6   : > { %2519 = vmatpush3.bf16.msra.mxu0 %v1643_v1  ;;  %2520 = vmatprep.mubr.msk.bf16.mxu0 %vm2710_vm6, %v2709_v33 }
 0x4f7   : > { %2530 = vmatprep.subr.bf16.mxu0 %v2709_v33 }
 0x4fa   : > { %v2638_v2 = vpop.eup %2637 }
 0x4fb   : > { %v1633_v3 = vsel %vm875_vm7, %v2638_v2, 0.0  ;;  %v1636_v4 = vpack.c.bf16 %v2638_v2, %v2638_v2 }
 0x4fc   : > { %1634 = vadd.xlane.f32.xlu1 %v1633_v3 }
 0x4fd   : > { %2521 = vmatmul.mubr.msk.bf16.vlgmr.msra.gmra.mrb[32].mxu0 %vm875_vm7, %v1636_v4 }
 0x4fe   : > { %2532 = vmatprep.mubr.msk.bf16.mxu0 %vm2710_vm6, %v2709_v33 }
 0x500   : > { %1278 = vadd.xlane.f32.xlu1 %v1277_v5 }
 0x504   : > { %929 = vadd.xlane.f32.xlu1 %v928_v6 }
 0x514   : > { %v1747_v7 = vpop.xlane.xlu1 %1746 }
 0x515   : > { %v1748_v8 = vsub.f32 %v3038_v13, %v1747_v7  ;;  %v1160_v13 = vsel %vm875_vm7, %v3061_v38, 0.0 }
 0x517   : > { %v1749_v9 = vmul.f32 1.442695, %v1748_v8 }
 0x518   : > { %v1756_v10 = vpop.permute.xlu1 %1755 }
 0x519   : > { %2639 = vpow2.f32 %v1749_v9  ;;  %v1761_v11 = vsel %vm937_vm8, %v1756_v10, 0 }
 0x51a   : > { %2531 = vmatpush3.bf16.msra.mxu0 %v1761_v11 }
 0x51b   : > { %2544 = vmatprep.subr.bf16.mxu0 %v2709_v33 }
 0x523   : > { %v2640_v12 = vpop.eup %2639 }
 0x524   : > { %v1751_v58 = vsel %vm875_vm7, %v2640_v12, 0.0  ;;  %v1754_v14 = vpack.c.bf16 %v2640_v12, %v2640_v12 }
 0x525   : > { %1752 = vadd.xlane.f32.xlu0 %v1751_v58 }
 0x526   : > { %2533 = vmatmul.mubr.msk.bf16.vlgmr.msra.gmra.mrb[36].mxu0 %vm875_vm7, %v1754_v14 }
 0x527   : > { %2548 = vmatprep.mubr.msk.bf16.mxu0 %vm2710_vm6, %v2709_v33 }
 0x529   : > { %1161 = vadd.xlane.f32.xlu0 %v1160_v13 }
 0x52d   : > { %1399 = vadd.xlane.f32.xlu0 %v1398_v15  ;;  %v2609_v15 = vld [vmem:[%s2852_s27] sm:$0xff]  }
 0x52e   : > { %2537 = vmatpush3.bf16.msra.mxu1 %v2609_v15  ;;  %v2615_v15 = vld [vmem:[%s2883_s19 + $0x10] sm:$0xff]  }
 0x52f   : > { %2538 = vmatprep.subr.bf16.mxu1 %v2709_v33 }
 0x544   : > { %v1045_v16 = vpop.xlane.xlu0 %1044 }
 0x545   : > { %2641 = vrcp.f32 %v1045_v16  ;;  %v2610_v16 = vld [vmem:[%s2852_s27 + $0x8] sm:$0xff]   ;;  %s3255_s27 = sld [smem:[#allocation9_spill]] }
 0x546   : > { %2539 = vmatpush3.bf16.msra.mxu1 %v2610_v16  ;;  %v2616_v16 = vld [vmem:[%s2883_s19 + $0x18] sm:$0xff]  }
 0x547   : > { %2552 = vmatprep.subr.bf16.mxu1 %v2709_v33 }
 0x54f   : > { %v2642_v26 = vpop.eup %2641 }
 0x57d   : > { %v1517_v47 = vpop.xlane.xlu0 %1516 }
 0x589   : > { %v1635_v17 = vpop.xlane.xlu1 %1634 }
 0x58c   : > { %v975_v20 = vpop.f32.mrb[8].mxu0 }
 0x58d   : > { %v2450_v21 = vpop.f32.mrb[9].mxu0  ;;  %v1279_v22 = vpop.xlane.xlu1 %1278 }
 0x58e   : > { %v978_v23 = vpop.f32.mrb[10].mxu0 }
 0x58f   : > { %v2451_v24 = vpop.f32.mrb[11].mxu0 }
 0x591   : > { %v930_v25 = vpop.xlane.xlu1 %929 }
 0x592   : > { %2643 = vrcp.f32 %v930_v25 }
 0x593   : > { %2645 = vrcp.f32 %v1279_v22 }
 0x594   : > { %v1089_v27 = vpop.f32.mrb[12].mxu0 }
 0x595   : > { %v1096_v28 = vmul.f32 %v2642_v26, %v1089_v27  ;;  %v2462_v29 = vpop.f32.mrb[13].mxu0 }
 0x596   : > { %v1092_v62 = vpop.f32.mrb[14].mxu0 }
 0x597   : > { %v1097_v32 = vpack.c.bf16 %v1096_v28, %v1096_v28  ;;  %v2463_v34 = vpop.f32.mrb[15].mxu0 }
 0x599   : > { %1099 = vrot.lane.b32.xlu0 %v1097_v32, %s2722_s25 }
 0x59c   : > { %v2644_v31 = vpop.eup %2643  ;;  %v1206_v30 = vpop.f32.mrb[16].mxu0 }
 0x59d   : > { %v2474_v35 = vpop.f32.mrb[17].mxu0  ;;  %v982_v36 = vmul.f32 %v2644_v31, %v975_v20  ;;  %v2646_v40 = vpop.eup %2645 }
 0x59e   : > { %v1209_v37 = vpop.f32.mrb[18].mxu0  ;;  %v752_v35 = vld [vmem:[%s3255_s27] sm:$0xff] }
 0x59f   : > { %v2475_v38 = vpop.f32.mrb[19].mxu0  ;;  %v983_v39 = vpack.c.bf16 %v982_v36, %v982_v36 }
 0x5a1   : > { %985 = vst.msk [vmem:[#allocation4] sm:$0xf] %vm984_vm9, %v983_v39  ;;  %v753_v39 = vld [vmem:[%s3255_s27 + $0x8] sm:$0xff] }
 0x5a4   : > { %v1323_v41 = vpop.f32.mrb[20].mxu0 }
 0x5a5   : > { %v1330_v42 = vmul.f32 %v2646_v40, %v1323_v41  ;;  %v2486_v43 = vpop.f32.mrb[21].mxu0 }
 0x5a6   : > { %v1326_v44 = vpop.f32.mrb[22].mxu0 }
 0x5a7   : > { %v1331_v45 = vpack.c.bf16 %v1330_v42, %v1330_v42  ;;  %v2487_v46 = vpop.f32.mrb[23].mxu0 }
 0x5a9   : > { %1333 = vrot.lane.b32.xlu0 %v1331_v45, %s2723_s26 }
 0x5b2   : > { %v1753_v48 = vpop.xlane.xlu0 %1752 }
 0x5b6   : > { %v1162_v49 = vpop.xlane.xlu0 %1161 }
 0x5b7   : > { %2647 = vrcp.f32 %v1162_v49 }
 0x5ba   : > { %v1400_v50 = vpop.xlane.xlu0 %1399 }
 0x5bb   : > { %2649 = vrcp.f32 %v1400_v50 }
 0x5bc   : > { %2651 = vrcp.f32 %v1517_v47 }
 0x5bd   : > { %2653 = vrcp.f32 %v1635_v17 }
 0x5be   : > { %2655 = vrcp.f32 %v1753_v48 }
 0x5c0   : > { %v1444_v51 = vpop.f32.mrb[24].mxu0 }
 0x5c1   : > { %v2648_v52 = vpop.eup %2647  ;;  %v2498_v53 = vpop.f32.mrb[25].mxu0 }
 0x5c2   : > { %v1447_v54 = vpop.f32.mrb[26].mxu0  ;;  %v1213_v55 = vmul.f32 %v2648_v52, %v1206_v30  ;;  %v2351_v30 = vld [vmem:[%s3256_s18] ss:$0 sm:$0xff] }
 0x5c3   : > { %v2499_v56 = vpop.f32.mrb[27].mxu0 }
 0x5c4   : > { %v1214_v57 = vpack.c.bf16 %v1213_v55, %v1213_v55 }
 0x5c5   : > { %v2650_v59 = vpop.eup %2649 }
 0x5c6   : > { %v1451_v60 = vmul.f32 %v2650_v59, %v1444_v51  ;;  %1216 = vrot.lane.b32.xlu1 %v1214_v57, %s2724_s28  ;;  %v2652_v61 = vpop.eup %2651  ;;  %v2611_v57 = vld [vmem:[%s2869_s2] sm:$0xff]   ;;  %v2612_v59 = vld [vmem:[%s2869_s2 + $0x8] sm:$0xff]   ;;  %s3257_s2 = scalar_lea.vmem %s3223_s10, %s2824_s23 }
 0x5c7   : > { %v2654_v8 = vpop.eup %2653  ;;  %2545 = vmatpush3.bf16.msra.mxu0 %v2611_v57 }
 0x5c8   : > { %v1452_v63 = vpack.c.bf16 %v1451_v60, %v1451_v60  ;;  %v1561_v0 = vpop.f32.mrb[28].mxu0  ;;  %v2656_v17 = vpop.eup %2655  ;;  %2546 = vmatprep.subr.bf16.mxu0 %v2709_v33 }
 0x5c9   : > { %v1568_v1 = vmul.f32 %v2652_v61, %v1561_v0  ;;  %v2510_v2 = vpop.f32.mrb[29].mxu0 }
 0x5ca   : > { %v1454_v3 = vrot.slane %v1452_v63, 4  ;;  %v1564_v4 = vpop.f32.mrb[30].mxu0 }
 0x5cb   : > { %v1569_v5 = vpack.c.bf16 %v1568_v1, %v1568_v1  ;;  %v2511_v6 = vpop.f32.mrb[31].mxu0  ;;  %2547 = vmatpush3.bf16.msra.mxu0 %v2612_v59 }
 0x5cc   : > { %1457 = vst.msk [vmem:[#allocation4] sm:$0xf0] %vm1456_vm10, %v1454_v3 }
 0x5cd   : > { %v1571_v7 = vrot.slane %v1569_v5, 4  ;;  %v2355_v5 = vld [vmem:[%s3257_s2] ss:$0 sm:$0xff] }
 0x5cf   : > { %1572 = vrot.lane.b32.xlu1 %v1571_v7, %s2722_s25 }
 0x5d0   : > { %v1679_v9 = vpop.f32.mrb[32].mxu0 }
 0x5d1   : > { %v1686_v10 = vmul.f32 %v2654_v8, %v1679_v9  ;;  %v2522_v11 = vpop.f32.mrb[33].mxu0  ;;  %v2356_v9 = vld [vmem:[%s683_s6] ss:$0 sm:$0xff] }
 0x5d2   : > { %v1682_v12 = vpop.f32.mrb[34].mxu0 }
 0x5d3   : > { %v1687_v58 = vpack.c.bf16 %v1686_v10, %v1686_v10  ;;  %v2523_v14 = vpop.f32.mrb[35].mxu0 }
 0x5d4   : > { %v2613_v14 = vld [vmem:[%s2883_s19] sm:$0xff]  }
 0x5d5   : > { %v1689_v13 = vrot.slane %v1687_v58, 4 }
 0x5d7   : > { %1690 = vrot.lane.b32.xlu1 %v1689_v13, %s2724_s28  ;;  %v2614_v13 = vld [vmem:[%s2883_s19 + $0x8] sm:$0xff]  }
 0x5f9   : > { %v1797_v20 = vpop.f32.mrb[36].mxu0 }
 0x5fa   : > { %v1804_v21 = vmul.f32 %v2656_v17, %v1797_v20  ;;  %v2534_v22 = vpop.f32.mrb[37].mxu0  ;;  %v2617_v17 = vld [vmem:[%s2883_s19 + $0x20] sm:$0xff]   ;;  %v2618_v20 = vld [vmem:[%s2883_s19 + $0x28] sm:$0xff]  }
 0x5fb   : > { %v1800_v23 = vpop.f32.mrb[38].mxu0  ;;  %v2620_v22 = vld [vmem:[%s2883_s19 + $0x38] sm:$0xff]  }
 0x5fc   : > { %v1805_v24 = vpack.c.bf16 %v1804_v21, %v1804_v21  ;;  %v2535_v25 = vpop.f32.mrb[39].mxu0  ;;  %v2619_v21 = vld [vmem:[%s2883_s19 + $0x30] sm:$0xff]   ;;  %v2357_v23 = vld [vmem:[%s691_s3] ss:$0 sm:$0xff] }
 0x5fe   : > { %v1807_v26 = vrot.slane %v1805_v24, 4 }
 0x600   : > { %1808 = vrot.lane.b32.xlu1 %v1807_v26, %s2723_s26 }
 0x60b   : > { %v1100_v27 = vpop.permute.xlu0 %1099 }
 0x60c   : > { %1103 = vst.msk [vmem:[#allocation4] sm:$0xf] %vm1102_vm11, %v1100_v27 }
 0x61b   : > { %v1334_v29 = vpop.permute.xlu0 %1333 }
 0x638   : > { %v1217_v28 = vpop.permute.xlu1 %1216 }
 0x639   : > { %1220 = vst.msk [vmem:[#allocation4] sm:$0xf] %vm1219_vm12, %v1217_v28 }
 0x63a   : > { %1337 = vst.msk [vmem:[#allocation4] sm:$0xf] %vm1336_vm13, %v1334_v29 }
 0x641   : > { %v1573_v62 = vpop.permute.xlu1 %1572 }
 0x642   : > { %1576 = vst.msk [vmem:[#allocation4] sm:$0xf0] %vm1575_vm14, %v1573_v62 }
 0x649   : > { %v1691_v32 = vpop.permute.xlu1 %1690 }
 0x64a   : > { %1694 = vst.msk [vmem:[#allocation4] sm:$0xf0] %vm1693_vm15, %v1691_v32 }
 0x672   : > { %v1809_v34 = vpop.permute.xlu1 %1808 }
 0x673   : > { %1812 = vst.msk [vmem:[#allocation4] sm:$0xf0] %vm1811_vm0, %v1809_v34 }
 0x67a   : > { %v1813_v31 = vld [vmem:[#allocation4] sm:$0xff] }
 0x67b   : > { %2541 = vmatmul.mubr.msk.bf16.vlgmr.msra.gmra.mrb[28].mxu1 %vm754_vm5, %v1813_v31 }
 0x67c   : > { %2568 = vmatprep.mubr.msk.bf16.mxu1 %vm2710_vm6, %v2709_v33  ;;  %2553 = vmatpush3.bf16.msra.mxu1 %v2613_v14 }
 0x67d   : > { %2554 = vmatprep.subr.bf16.mxu1 %v2709_v33 }
 0x680   : > { %2555 = vmatpush3.bf16.msra.mxu1 %v2614_v13 }
 0x681   : > { %2556 = vmatprep.subr.bf16.mxu1 %v2709_v33 }
 0x684   : > { %2557 = vmatpush3.bf16.msra.mxu1 %v2615_v15 }
 0x685   : > { %2558 = vmatprep.subr.bf16.mxu1 %v2709_v33 }
 0x688   : > { %2559 = vmatpush3.bf16.msra.mxu1 %v2616_v16 }
 0x689   : > { %2560 = vmatprep.subr.bf16.mxu1 %v2709_v33 }
 0x68c   : > { %2561 = vmatpush3.bf16.msra.mxu1 %v2617_v17 }
 0x68d   : > { %2562 = vmatprep.subr.bf16.mxu1 %v2709_v33 }
 0x690   : > { %2563 = vmatpush3.bf16.msra.mxu1 %v2618_v20 }
 0x691   : > { %2564 = vmatprep.subr.bf16.mxu1 %v2709_v33 }
 0x694   : > { %2565 = vmatpush3.bf16.msra.mxu1 %v2619_v21 }
 0x695   : > { %2566 = vmatprep.subr.bf16.mxu1 %v2709_v33 }
 0x698   : > { %2567 = vmatpush3.bf16.msra.mxu1 %v2620_v22 }
 0x74e   : > { %v1874_v36 = vpop.f32.mrb[28].mxu1 }
 0x74f   : > { %v1875_v37 = vadd.f32 %v2351_v30, %v1874_v36  ;;  %v2542_v38 = vpop.f32.mrb[29].mxu1 }
 0x750   : > { %v1877_v40 = vpop.f32.mrb[30].mxu1 }
 0x751   : > { %v1881_v41 = vmul.f32 %v1875_v37, %v752_v35  ;;  %v1878_v42 = vadd.f32 %v2351_v30, %v1877_v40  ;;  %v2543_v43 = vpop.f32.mrb[31].mxu1  ;;  %v2363_v40 = vld [vmem:[%s699_s30] ss:$0 sm:$0xff] }
 0x753   : > { %v3125_v44 = vadd.f32 %v1881_v41, %v2904_v18  ;;  %v1882_v45 = vmul.f32 %v1878_v42, %v753_v39 }
 0x755   : > { %v3128_v46 = vadd.f32 %v1882_v45, %v2906_v19  ;;  %v1885_v47 = vsel %vm754_vm5, %v3125_v44, 0.0 }
 0x756   : > { %1886 = vadd.xlane.f32.xlu0 %v1885_v47 }
 0x757   : > { %v1888_v48 = vsel %vm754_vm5, %v3128_v46, 0.0 }
 0x758   : > { %1889 = vadd.xlane.f32.xlu1 %v1888_v48 }
 0x769   : > { %2128 = vrot.lane.b32.xlu1 %v753_v39, %s2712_s16 }
 0x7e3   : > { %v1887_v49 = vpop.xlane.xlu0 %1886 }
 0x7e4   : > { %v1891_v50 = vmul.f32 0.03125, %v1887_v49 }
 0x7e5   : > { %v1890_v18 = vpop.xlane.xlu1 %1889 }
 0x7e6   : > { %v1893_v51 = vsub.f32 %v3125_v44, %v1891_v50  ;;  %v1892_v52 = vmul.f32 0.03125, %v1890_v18 }
 0x7e8   : > { %v1894_v19 = vsub.f32 %v3128_v46, %v1892_v52  ;;  %v1895_v53 = vmul.f32 %v1893_v51, %v1893_v51 }
 0x7e9   : > { %v2129_v48 = vpop.permute.xlu1 %2128 }
 0x7ea   : > { %v1897_v54 = vsel %vm754_vm5, %v1895_v53, 0.0  ;;  %v1896_v55 = vmul.f32 %v1894_v19, %v1894_v19 }
 0x7eb   : > { %1898 = vadd.xlane.f32.xlu0 %v1897_v54 }
 0x7ec   : > { %v1900_v56 = vsel %vm754_vm5, %v1896_v55, 0.0 }
 0x7ef   : > { %1901 = vadd.xlane.f32.xlu0 %v1900_v56 }
 0x805   : > { %2126 = vrot.lane.b32.xlu0 %v752_v35, %s2712_s16 }
 0x878   : > { %v1899_v60 = vpop.xlane.xlu0 %1898 }
 0x879   : > { %v1903_v61 = vmul.f32 0.03125, %v1899_v60 }
 0x87b   : > { %v1905_v63 = vadd.f32 1e-06, %v1903_v61 }
 0x87c   : > { %v1902_v0 = vpop.xlane.xlu0 %1901 }
 0x87d   : > { %2657 = vrsqrt.f32 %v1905_v63  ;;  %v1904_v1 = vmul.f32 0.03125, %v1902_v0 }
 0x87f   : > { %v1906_v2 = vadd.f32 1e-06, %v1904_v1 }
 0x880   : > { %v2127_v42 = vpop.permute.xlu0 %2126 }
 0x881   : > { %2659 = vrsqrt.f32 %v1906_v2 }
 0x887   : > { %v2658_v3 = vpop.eup %2657 }
 0x888   : > { %v1909_v4 = vmul.f32 %v2658_v3, %v1893_v51 }
 0x88a   : > { %v1918_v7 = vmul.f32 %v2355_v5, %v1909_v4 }
 0x88b   : > { %v2660_v6 = vpop.eup %2659 }
 0x88c   : > { %v1910_v8 = vmul.f32 %v2660_v6, %v1894_v19  ;;  %v1927_v11 = vadd.f32 %v2356_v9, %v1918_v7 }
 0x88e   : > { %v1919_v10 = vmul.f32 %v2355_v5, %v1910_v8 }
 0x890   : > { %v1928_v12 = vadd.f32 %v2356_v9, %v1919_v10 }
 0x892   : > { %v1929_v58 = vpack.c.bf16 %v1928_v12, %v1927_v11 }
 0x894   : > { %2549 = vmatmul.mubr.msk.bf16.vlgmr.msra.gmra.mrb[40].mxu0 %vm754_vm5, %v1929_v58 }
 0x967   : > { %v1990_v24 = vpop.f32.mrb[40].mxu0 }
 0x968   : > { %v1991_v25 = vadd.f32 %v2357_v23, %v1990_v24  ;;  %v2550_v26 = vpop.f32.mrb[41].mxu0 }
 0x969   : > { %v1993_v27 = vpop.f32.mrb[42].mxu0 }
 0x96a   : > { %v2361_v28 = vmul.f32 -1.442695, %v1991_v25  ;;  %v1994_v29 = vadd.f32 %v2357_v23, %v1993_v27  ;;  %v2551_v62 = vpop.f32.mrb[43].mxu0 }
 0x96c   : > { %2661 = vpow2.f32 %v2361_v28  ;;  %v2362_v32 = vmul.f32 -1.442695, %v1994_v29 }
 0x96e   : > { %2663 = vpow2.f32 %v2362_v32 }
 0x976   : > { %v2662_v34 = vpop.eup %2661 }
 0x977   : > { %v2003_v33 = vadd.f32 1.0, %v2662_v34 }
 0x978   : > { %v2664_v31 = vpop.eup %2663 }
 0x979   : > { %2665 = vrcp.f32 %v2003_v33  ;;  %v2004_v30 = vadd.f32 1.0, %v2664_v31 }
 0x97b   : > { %2667 = vrcp.f32 %v2004_v30 }
 0x983   : > { %v2666_v35 = vpop.eup %2665 }
 0x984   : > { %v2009_v37 = vmul.f32 %v2666_v35, %v1991_v25 }
 0x985   : > { %v2668_v36 = vpop.eup %2667 }
 0x986   : > { %v2010_v38 = vmul.f32 %v2668_v36, %v1994_v29 }
 0x988   : > { %v2011_v39 = vpack.c.bf16 %v2010_v38, %v2009_v37 }
 0x98a   : > { %2569 = vmatmul.mubr.bf16.vlgmr.msra.gmra.mrb[32].mxu1 %v2011_v39 }
 0xa5d   : > { %v2117_v41 = vpop.f32.mrb[32].mxu1 }
 0xa5e   : > { %v2118_v43 = vadd.f32 %v2363_v40, %v2117_v41  ;;  %v2570_v45 = vpop.f32.mrb[33].mxu1 }
 0xa5f   : > { %v2120_v47 = vpop.f32.mrb[34].mxu1 }
 0xa60   : > { %v2132_v49 = vmul.f32 %v2127_v42, %v2118_v43  ;;  %v2121_v50 = vadd.f32 %v2363_v40, %v2120_v47  ;;  %v2571_v18 = vpop.f32.mrb[35].mxu1  ;;  %2141 = sbr.rel (%p2372_p5) target bundleno = 2663 (0xa67), region = 92 }
 0xa62   : > { %v2134_v51 = vadd.f32 %v2132_v49, %v3125_v44  ;;  %v2133_v52 = vmul.f32 %v2129_v48, %v2121_v50 }
 0xa64   : > { %2136 = vst.msk [vmem:[#allocation2] sm:$0xff] %vm754_vm5, %v2134_v51  ;;  %v2135_v19 = vadd.f32 %v2133_v52, %v3128_v46  ;;  %2142 = vst.msk [vmem:[#allocation5] sm:$0xff] (!%p2372_p5), %vm754_vm5, %v2134_v51 }
 0xa66   : > { %2137 = vst.msk [vmem:[#allocation2 + $0x8] sm:$0xff] %vm754_vm5, %v2135_v19  ;;  %2143 = vst.msk [vmem:[#allocation5 + $0x8] sm:$0xff] (!%p2372_p5), %vm754_vm5, %v2135_v19 }
 0xa67 PF: > { %p2576_p6 = scmp.eq.s32.totalorder %s2818_s22, 1  ;;  %s2725_s23 = smov [#allocation5]  }
 0xa68   : > { %s2150_s30 = sshll.u32 %s2725_s23, 4  ;;  %s2151_s30 = int_to_ptr.vmem [resolvable:$true] %s2150_s30 }
 0xa69   : > { %s2669_s28 = scalar_lea.vmem %s2151_s30, 256  ;;  %p2676_p10 = scmp.lt.s32.totalorder %s2151_s30, %s2151_s30 }
 0xa6a   : > { %p2670_p7 = scmp.ne.s32.totalorder %s2151_s30, %s2669_s28  ;;  %p2677_p11 = scmp.lt.s32.totalorder %s2669_s28, %s2669_s28 }
 0xa6c   : > { %p2671_p8 = pnand %p2670_p7, %p2576_p6  ;;  %p2678_p12 = por %p2677_p11, %p2676_p10 }
 0xa6e   : > { %p2672_p9 = pneg %p2671_p8 }
 0xa70   : > { %p2679_p13 = pnand %p2678_p12, %p2672_p9 }
 0xa72   : > { %2682 = shalt.err (!%p2679_p13)
}
 0xa73   : > { %s3258_s17 = sld [smem:[#allocation16_spill]] }
 0xa79   : > { %s2683_s18 = scalar_lea.hbm %s3258_s17, 256 }
 0xa7a   : > { %p2684_p0 = scmp.ne.s32.totalorder %s3258_s17, %s2683_s18  ;;  %p2689_p3 = scmp.lt.u32.totalorder %s2683_s18, %s3258_s17 }
 0xa7c   : > { %p2685_p1 = pnand %p2684_p0, %p2576_p6 }
 0xa7e   : > { %p2686_p2 = pneg %p2685_p1 }
 0xa80   : > { %p2691_p4 = pnand %p2689_p3, %p2686_p2 }
 0xa82   : > { %2694 = shalt.err (!%p2691_p4)
}
 0xa83   : > { %s2726_s1 = smov 128  }
 0xa84   : > { %2573 = dma.vmem_to_hbm [thread:$0]  (%p2576_p6), %s2151_s30, 256, %s3258_s17, [#allocation6], %s2726_s1, %s2726_s1, %s2722_s25  }
 0xa85   : > { %2700 = dma.done.wait (%p2576_p6), [#allocation6], 256  }
 0xa86   : > { %2702 = vsyncadd (%p2576_p6), [#allocation6], 4294967040 }
 0xa87 PF: > { %s3259_s3 = sld [smem:[#allocation8_spill]] }
 0xa8d   : > { %s27_s21 = sadd.s32 1, %s3259_s3  }
 0xa8e   : > { %p24_p5 = scmp.ge.s32.totalorder %s27_s21, 4  }
 0xa90   :  { %26 = sbr.rel (!%p24_p5) target bundleno = 9 (0x9), region = 156 }
 0xa97   :  { %2166 = vsyncpa [#allocation6], 1 }
 0xa98   :  { %2168 = vsyncpa [#allocation6 + $0x1], 1 }

</bundles_post_ra>
